<compile_context>
chip_gen: v7x
topology: tpu7x:2x2x1
jax: 0.10.0
libtpu: 0.0.40
codegen_flags: <defaults>
</compile_context>

<pallas_src>
import functools

import jax
import jax.numpy as jnp
from jax.experimental import pallas as pl
from jax.experimental.pallas import tpu as pltpu


def _attention_kernel(x_ref, wqkv_ref, wo_ref, b_ref, o_ref, qkv_ref, ctx_ref,
                      *, heads, seq):
    """One grid step = one block of batch elements, all heads.

    x_ref    : (Bb*N, DIM)     f32   activations (2-D slab)
    wqkv_ref : (DIM, 3*DIM)    bf16  fused to_qkv weight, scale folded into q cols
    wo_ref   : (DIM, DIM)      bf16  to_out[0].weight (stored (in, out))
    b_ref    : (1, DIM)        f32   to_out[0].bias
    o_ref    : (Bb*N, DIM)     f32   output slab
    qkv_ref  : (Bb*N, 3*DIM)   f32   VMEM scratch, fused projection
    ctx_ref  : (Bb*N, DIM)     f32   VMEM scratch, per-head context slab
    """
    rows, dim = x_ref.shape
    n = seq
    bb = rows // n
    h_cnt = heads
    d = dim // h_cnt
    bf16 = jnp.bfloat16

    # --- Fused q/k/v projection: one wide MXU matmul (scale already folded). ---
    qkv_ref[...] = jnp.dot(x_ref[...].astype(bf16), wqkv_ref[...],
                           preferred_element_type=jnp.float32)

    # --- Per-(batch, head) attention on tiny 2-D tiles. ---
    # TODO(synk): for long sequences (N >~ 256-512) switch this stage to a
    # key-tiled streaming (flash-style) softmax and set vmem_limit_bytes.
    for h in range(h_cnt):
        qc, kc, vc = h * d, dim + h * d, 2 * dim + h * d
        for b in range(bb):
            r0 = b * n
            q = qkv_ref[r0:r0 + n, qc:qc + d].astype(bf16)           # (N, d)
            k = qkv_ref[r0:r0 + n, kc:kc + d].astype(bf16)           # (N, d)
            v = qkv_ref[r0:r0 + n, vc:vc + d].astype(bf16)           # (N, d)

            s = jnp.dot(q, k.T, preferred_element_type=jnp.float32)  # (N, N)
            s = s - jnp.max(s, axis=-1, keepdims=True)
            p = jnp.exp(s)
            attn = p * pl.reciprocal(jnp.sum(p, axis=-1, keepdims=True),
                                     approx=False)
            ctx_ref[r0:r0 + n, h * d:(h + 1) * d] = jnp.dot(
                attn.astype(bf16), v, preferred_element_type=jnp.float32)

    # --- Fused output projection over all heads at once (K = DIM) + bias. ---
    out = jnp.dot(ctx_ref[...].astype(bf16), wo_ref[...],
                  preferred_element_type=jnp.float32)
    out = out + b_ref[...]
    o_ref[...] = out.astype(o_ref.dtype)

    # TODO(synk): mask=True path (masked_fill with -finfo.max) and the
    # return_tok branch are not exercised by the default forward call and are
    # intentionally not implemented here.


def attention_forward(x, w_qkv, w_out, b_out, *, heads, scale,
                      mask=None, return_tok=False, batch_blocks=1):
    """Forward pass of the Attention module.

    x      : (B, N, DIM)
    w_qkv  : (DIM, 3*DIM)  to_qkv weight stored (in, out)  [= torch weight.T]
    w_out  : (DIM, DIM)    to_out[0] weight stored (in, out)
    b_out  : (1, DIM)      to_out[0] bias
    batch_blocks: grid size over batch.  1 (default) runs the whole batch in a
      single kernel step — best on single-TensorCore v5e/v6e and the safe
      default on v7x; only use 2 on v7x if a measurement shows the 2-TC split
      beats the added per-step overhead and duplicated weight DMA.  For large
      batches, raise batch_blocks to bound the in-kernel unroll (Bb * heads).
    """
    assert mask is None and not return_tok, (
        "mask / return_tok paths are not implemented in the Pallas kernel")
    B, N, DIM = x.shape
    assert DIM % heads == 0 and B % batch_blocks == 0
    Bb = B // batch_blocks

    # One-time, layout-only parameter prep: fuse q/k/v weights into a single
    # (DIM, 3*DIM) slab with the attention scale folded into the q columns,
    # and pre-cast MXU operands to bf16.
    wqkv = jnp.concatenate([w_qkv[:, :DIM] * scale, w_qkv[:, DIM:]],
                           axis=1).astype(jnp.bfloat16)               # (DIM, 3*DIM)
    wo = w_out.astype(jnp.bfloat16)                                   # (DIM, DIM)
    bias = b_out.reshape(1, DIM).astype(jnp.float32)

    # Present activations / output as 2-D (B*N, DIM) slabs (wrapper-side
    # reshape; free outside the kernel).
    x2d = x.reshape(B * N, DIM)

    kernel = functools.partial(_attention_kernel, heads=heads, seq=N)
    out2d = pl.pallas_call(
        kernel,
        out_shape=jax.ShapeDtypeStruct((B * N, DIM), x.dtype),
        grid=(batch_blocks,),
        in_specs=[
            pl.BlockSpec((Bb * N, DIM), lambda i: (i, 0)),
            pl.BlockSpec((DIM, 3 * DIM), lambda i: (0, 0)),
            pl.BlockSpec((DIM, DIM), lambda i: (0, 0)),
            pl.BlockSpec((1, DIM), lambda i: (0, 0)),
        ],
        out_specs=pl.BlockSpec((Bb * N, DIM), lambda i: (i, 0)),
        scratch_shapes=[
            pltpu.VMEM((Bb * N, 3 * DIM), jnp.float32),   # fused qkv projection
            pltpu.VMEM((Bb * N, DIM), jnp.float32),       # per-head context slab
        ],
        compiler_params=pltpu.CompilerParams(
            dimension_semantics=("parallel",)),
    )(x2d, wqkv, wo, bias)
    return out2d.reshape(B, N, DIM)


def attention_reference(x, w_qkv, w_out, b_out, *, heads, scale):
    """Pure-JAX f32 reference mirroring the PyTorch forward."""
    b, n, dim = x.shape
    d = dim // heads
    qkv = x @ w_qkv                                  # (b, n, 3*dim)
    q, k, v = jnp.split(qkv, 3, axis=-1)

    def to_heads(t):                                 # 'b n (h d) -> b h n d'
        return t.reshape(b, n, heads, d).transpose(0, 2, 1, 3)

    q, k, v = map(to_heads, (q, k, v))
    dots = jnp.einsum('bhid,bhjd->bhij', q, k) * scale
    attn = jax.nn.softmax(dots, axis=-1)
    out = jnp.einsum('bhij,bhjd->bhid', attn, v)
    out = out.transpose(0, 2, 1, 3).reshape(b, n, dim)   # 'b h n d -> b n (h d)'
    return out @ w_out + b_out


if __name__ == "__main__":
    # Small shapes consistent with the module: batch=2, seq=8, dim=32, heads=8.
    B, N, DIM, HEADS = 2, 8, 32, 8
    SCALE = DIM ** (-0.5)   # scale_with_head=False (module default)

    key = jax.random.PRNGKey(0)
    k_x, k_qkv, k_out, k_b = jax.random.split(key, 4)
    x = jax.random.normal(k_x, (B, N, DIM), dtype=jnp.float32)
    # Deterministic synthetic parameters (stored as (in, out)).
    w_qkv = jax.random.normal(k_qkv, (DIM, 3 * DIM), dtype=jnp.float32) * 0.05
    w_out = jax.random.normal(k_out, (DIM, DIM), dtype=jnp.float32) * 0.05
    b_out = jax.random.normal(k_b, (1, DIM), dtype=jnp.float32) * 0.05

    out = attention_forward(x, w_qkv, w_out, b_out, heads=HEADS, scale=SCALE)
    out = jax.block_until_ready(out)

    ref = attention_reference(x, w_qkv, w_out, b_out, heads=HEADS, scale=SCALE)
    assert out.shape == (B, N, DIM)
    # bf16 MXU operands give ~1e-3-level drift vs the f32 reference, hence the
    # loosened tolerance.
    assert jnp.allclose(out, ref, atol=2e-2, rtol=2e-2), "mismatch vs reference"

    print("KERNEL_OK")
</pallas_src>

<mosaic_0001>
module attributes {stable_mosaic.version = 11 : i64} {
  func.func @_attention_kernel(%arg0: i32, %arg1: memref<16x32xf32, #tpu.memory_space<vmem>>, %arg2: memref<32x96xbf16, #tpu.memory_space<vmem>>, %arg3: memref<32x32xbf16, #tpu.memory_space<vmem>>, %arg4: memref<1x32xf32, #tpu.memory_space<vmem>>, %arg5: memref<16x32xf32, #tpu.memory_space<vmem>>, %arg6: memref<16x96xf32, #tpu.memory_space<vmem>>, %arg7: memref<16x32xf32, #tpu.memory_space<vmem>>) attributes {dimension_semantics = [#tpu.dimension_semantics<parallel>], iteration_bounds = array<i64: 1>, scalar_prefetch = 0 : i64, scratch_operands = 2 : i64, tpu.core_type = #tpu.core_type<tc>, window_params = [{transform_indices = @transform_0, window_bounds = array<i64: 16, 32>}, {pipeline_mode = #tpu.pipeline_mode<synchronous>, transform_indices = @transform_1, window_bounds = array<i64: 32, 96>}, {pipeline_mode = #tpu.pipeline_mode<synchronous>, transform_indices = @transform_2, window_bounds = array<i64: 32, 32>}, {pipeline_mode = #tpu.pipeline_mode<synchronous>, transform_indices = @transform_3, window_bounds = array<i64: 1, 32>}, {transform_indices = @transform_4, window_bounds = array<i64: 16, 32>}]} {
    %c0 = arith.constant 0 : index
    %c0_0 = arith.constant 0 : index
    %0 = vector.load %arg1[%c0, %c0_0] : memref<16x32xf32, #tpu.memory_space<vmem>>, vector<16x32xf32>
    %1 = arith.truncf %0 : vector<16x32xf32> to vector<16x32xbf16>
    %c0_1 = arith.constant 0 : index
    %c0_2 = arith.constant 0 : index
    %2 = vector.load %arg2[%c0_1, %c0_2] : memref<32x96xbf16, #tpu.memory_space<vmem>>, vector<32x96xbf16>
    %cst = arith.constant dense<0.000000e+00> : vector<16x96xf32>
    %3 = tpu.matmul %1, %2, %cst {dimension_numbers = #tpu.dot_dimension_numbers<[1], [0], [0], [1], [0, 0, 1, 1], [], []>} : vector<16x32xbf16>, vector<32x96xbf16>, vector<16x96xf32> -> vector<16x96xf32>
    %c0_3 = arith.constant 0 : index
    %c0_4 = arith.constant 0 : index
    %4 = vector.load %arg6[%c0_3, %c0_4] : memref<16x96xf32, #tpu.memory_space<vmem>>, vector<16x96xf32>
    tpu.vector_store %arg6[%c0_3, %c0_4], %3 {strides = array<i32>} : memref<16x96xf32, #tpu.memory_space<vmem>>, vector<16x96xf32>,
    %c0_5 = arith.constant 0 : index
    %c0_6 = arith.constant 0 : index
    %5 = vector.load %arg6[%c0_5, %c0_6] : memref<16x96xf32, #tpu.memory_space<vmem>>, vector<8x4xf32>
    %6 = arith.truncf %5 : vector<8x4xf32> to vector<8x4xbf16>
    %c0_7 = arith.constant 0 : index
    %c32 = arith.constant 32 : index
    %7 = vector.load %arg6[%c0_7, %c32] : memref<16x96xf32, #tpu.memory_space<vmem>>, vector<8x4xf32>
    %8 = arith.truncf %7 : vector<8x4xf32> to vector<8x4xbf16>
    %c0_8 = arith.constant 0 : index
    %c64 = arith.constant 64 : index
    %9 = vector.load %arg6[%c0_8, %c64] : memref<16x96xf32, #tpu.memory_space<vmem>>, vector<8x4xf32>
    %10 = arith.truncf %9 : vector<8x4xf32> to vector<8x4xbf16>
    %11 = tpu.transpose %8, [1, 0] : vector<8x4xbf16> -> vector<4x8xbf16>
    %cst_9 = arith.constant dense<0.000000e+00> : vector<8x8xf32>
    %12 = tpu.matmul %6, %11, %cst_9 {dimension_numbers = #tpu.dot_dimension_numbers<[1], [0], [0], [1], [0, 0, 1, 1], [], []>} : vector<8x4xbf16>, vector<4x8xbf16>, vector<8x8xf32> -> vector<8x8xf32>
    %cst_10 = arith.constant dense<0xFF800000> : vector<8xf32>
    %13 = vector.multi_reduction <maximumf>, %12, %cst_10 [1] : vector<8x8xf32> to vector<8xf32>
    %14 = vector.shape_cast %13 : vector<8xf32> to vector<8x1xf32>
    %15 = vector.broadcast %14 : vector<8x1xf32> to vector<8x8xf32>
    %16 = arith.subf %12, %15 : vector<8x8xf32>
    %17 = math.exp %16 : vector<8x8xf32>
    %cst_11 = arith.constant dense<0.000000e+00> : vector<8xf32>
    %18 = vector.multi_reduction <add>, %17, %cst_11 [1] : vector<8x8xf32> to vector<8xf32>
    %19 = vector.shape_cast %18 : vector<8xf32> to vector<8x1xf32>
    %20 = tpu.reciprocal %19 : vector<8x1xf32> -> vector<8x1xf32>
    %21 = vector.broadcast %20 : vector<8x1xf32> to vector<8x8xf32>
    %22 = arith.mulf %17, %21 : vector<8x8xf32>
    %23 = arith.truncf %22 : vector<8x8xf32> to vector<8x8xbf16>
    %cst_12 = arith.constant dense<0.000000e+00> : vector<8x4xf32>
    %24 = tpu.matmul %23, %10, %cst_12 {dimension_numbers = #tpu.dot_dimension_numbers<[1], [0], [0], [1], [0, 0, 1, 1], [], []>} : vector<8x8xbf16>, vector<8x4xbf16>, vector<8x4xf32> -> vector<8x4xf32>
    %c0_13 = arith.constant 0 : index
    %c0_14 = arith.constant 0 : index
    %25 = vector.load %arg7[%c0_13, %c0_14] : memref<16x32xf32, #tpu.memory_space<vmem>>, vector<8x4xf32>
    tpu.vector_store %arg7[%c0_13, %c0_14], %24 {strides = array<i32>} : memref<16x32xf32, #tpu.memory_space<vmem>>, vector<8x4xf32>,
    %c8 = arith.constant 8 : index
    %c0_15 = arith.constant 0 : index
    %26 = vector.load %arg6[%c8, %c0_15] : memref<16x96xf32, #tpu.memory_space<vmem>>, vector<8x4xf32>
    %27 = arith.truncf %26 : vector<8x4xf32> to vector<8x4xbf16>
    %c8_16 = arith.constant 8 : index
    %c32_17 = arith.constant 32 : index
    %28 = vector.load %arg6[%c8_16, %c32_17] : memref<16x96xf32, #tpu.memory_space<vmem>>, vector<8x4xf32>
    %29 = arith.truncf %28 : vector<8x4xf32> to vector<8x4xbf16>
    %c8_18 = arith.constant 8 : index
    %c64_19 = arith.constant 64 : index
    %30 = vector.load %arg6[%c8_18, %c64_19] : memref<16x96xf32, #tpu.memory_space<vmem>>, vector<8x4xf32>
    %31 = arith.truncf %30 : vector<8x4xf32> to vector<8x4xbf16>
    %32 = tpu.transpose %29, [1, 0] : vector<8x4xbf16> -> vector<4x8xbf16>
    %cst_20 = arith.constant dense<0.000000e+00> : vector<8x8xf32>
    %33 = tpu.matmul %27, %32, %cst_20 {dimension_numbers = #tpu.dot_dimension_numbers<[1], [0], [0], [1], [0, 0, 1, 1], [], []>} : vector<8x4xbf16>, vector<4x8xbf16>, vector<8x8xf32> -> vector<8x8xf32>
    %cst_21 = arith.constant dense<0xFF800000> : vector<8xf32>
    %34 = vector.multi_reduction <maximumf>, %33, %cst_21 [1] : vector<8x8xf32> to vector<8xf32>
    %35 = vector.shape_cast %34 : vector<8xf32> to vector<8x1xf32>
    %36 = vector.broadcast %35 : vector<8x1xf32> to vector<8x8xf32>
    %37 = arith.subf %33, %36 : vector<8x8xf32>
    %38 = math.exp %37 : vector<8x8xf32>
    %cst_22 = arith.constant dense<0.000000e+00> : vector<8xf32>
    %39 = vector.multi_reduction <add>, %38, %cst_22 [1] : vector<8x8xf32> to vector<8xf32>
    %40 = vector.shape_cast %39 : vector<8xf32> to vector<8x1xf32>
    %41 = tpu.reciprocal %40 : vector<8x1xf32> -> vector<8x1xf32>
    %42 = vector.broadcast %41 : vector<8x1xf32> to vector<8x8xf32>
    %43 = arith.mulf %38, %42 : vector<8x8xf32>
    %44 = arith.truncf %43 : vector<8x8xf32> to vector<8x8xbf16>
    %cst_23 = arith.constant dense<0.000000e+00> : vector<8x4xf32>
    %45 = tpu.matmul %44, %31, %cst_23 {dimension_numbers = #tpu.dot_dimension_numbers<[1], [0], [0], [1], [0, 0, 1, 1], [], []>} : vector<8x8xbf16>, vector<8x4xbf16>, vector<8x4xf32> -> vector<8x4xf32>
    %c8_24 = arith.constant 8 : index
    %c0_25 = arith.constant 0 : index
    %46 = vector.load %arg7[%c8_24, %c0_25] : memref<16x32xf32, #tpu.memory_space<vmem>>, vector<8x4xf32>
    tpu.vector_store %arg7[%c8_24, %c0_25], %45 {strides = array<i32>} : memref<16x32xf32, #tpu.memory_space<vmem>>, vector<8x4xf32>,
    %c0_26 = arith.constant 0 : index
    %c4 = arith.constant 4 : index
    %47 = vector.load %arg6[%c0_26, %c4] : memref<16x96xf32, #tpu.memory_space<vmem>>, vector<8x4xf32>
    %48 = arith.truncf %47 : vector<8x4xf32> to vector<8x4xbf16>
    %c0_27 = arith.constant 0 : index
    %c36 = arith.constant 36 : index
    %49 = vector.load %arg6[%c0_27, %c36] : memref<16x96xf32, #tpu.memory_space<vmem>>, vector<8x4xf32>
    %50 = arith.truncf %49 : vector<8x4xf32> to vector<8x4xbf16>
    %c0_28 = arith.constant 0 : index
    %c68 = arith.constant 68 : index
    %51 = vector.load %arg6[%c0_28, %c68] : memref<16x96xf32, #tpu.memory_space<vmem>>, vector<8x4xf32>
    %52 = arith.truncf %51 : vector<8x4xf32> to vector<8x4xbf16>
    %53 = tpu.transpose %50, [1, 0] : vector<8x4xbf16> -> vector<4x8xbf16>
    %cst_29 = arith.constant dense<0.000000e+00> : vector<8x8xf32>
    %54 = tpu.matmul %48, %53, %cst_29 {dimension_numbers = #tpu.dot_dimension_numbers<[1], [0], [0], [1], [0, 0, 1, 1], [], []>} : vector<8x4xbf16>, vector<4x8xbf16>, vector<8x8xf32> -> vector<8x8xf32>
    %cst_30 = arith.constant dense<0xFF800000> : vector<8xf32>
    %55 = vector.multi_reduction <maximumf>, %54, %cst_30 [1] : vector<8x8xf32> to vector<8xf32>
    %56 = vector.shape_cast %55 : vector<8xf32> to vector<8x1xf32>
    %57 = vector.broadcast %56 : vector<8x1xf32> to vector<8x8xf32>
    %58 = arith.subf %54, %57 : vector<8x8xf32>
    %59 = math.exp %58 : vector<8x8xf32>
    %cst_31 = arith.constant dense<0.000000e+00> : vector<8xf32>
    %60 = vector.multi_reduction <add>, %59, %cst_31 [1] : vector<8x8xf32> to vector<8xf32>
    %61 = vector.shape_cast %60 : vector<8xf32> to vector<8x1xf32>
    %62 = tpu.reciprocal %61 : vector<8x1xf32> -> vector<8x1xf32>
    %63 = vector.broadcast %62 : vector<8x1xf32> to vector<8x8xf32>
    %64 = arith.mulf %59, %63 : vector<8x8xf32>
    %65 = arith.truncf %64 : vector<8x8xf32> to vector<8x8xbf16>
    %cst_32 = arith.constant dense<0.000000e+00> : vector<8x4xf32>
    %66 = tpu.matmul %65, %52, %cst_32 {dimension_numbers = #tpu.dot_dimension_numbers<[1], [0], [0], [1], [0, 0, 1, 1], [], []>} : vector<8x8xbf16>, vector<8x4xbf16>, vector<8x4xf32> -> vector<8x4xf32>
    %c0_33 = arith.constant 0 : index
    %c4_34 = arith.constant 4 : index
    %67 = vector.load %arg7[%c0_33, %c4_34] : memref<16x32xf32, #tpu.memory_space<vmem>>, vector<8x4xf32>
    tpu.vector_store %arg7[%c0_33, %c4_34], %66 {strides = array<i32>} : memref<16x32xf32, #tpu.memory_space<vmem>>, vector<8x4xf32>,
    %c8_35 = arith.constant 8 : index
    %c4_36 = arith.constant 4 : index
    %68 = vector.load %arg6[%c8_35, %c4_36] : memref<16x96xf32, #tpu.memory_space<vmem>>, vector<8x4xf32>
    %69 = arith.truncf %68 : vector<8x4xf32> to vector<8x4xbf16>
    %c8_37 = arith.constant 8 : index
    %c36_38 = arith.constant 36 : index
    %70 = vector.load %arg6[%c8_37, %c36_38] : memref<16x96xf32, #tpu.memory_space<vmem>>, vector<8x4xf32>
    %71 = arith.truncf %70 : vector<8x4xf32> to vector<8x4xbf16>
    %c8_39 = arith.constant 8 : index
    %c68_40 = arith.constant 68 : index
    %72 = vector.load %arg6[%c8_39, %c68_40] : memref<16x96xf32, #tpu.memory_space<vmem>>, vector<8x4xf32>
    %73 = arith.truncf %72 : vector<8x4xf32> to vector<8x4xbf16>
    %74 = tpu.transpose %71, [1, 0] : vector<8x4xbf16> -> vector<4x8xbf16>
    %cst_41 = arith.constant dense<0.000000e+00> : vector<8x8xf32>
    %75 = tpu.matmul %69, %74, %cst_41 {dimension_numbers = #tpu.dot_dimension_numbers<[1], [0], [0], [1], [0, 0, 1, 1], [], []>} : vector<8x4xbf16>, vector<4x8xbf16>, vector<8x8xf32> -> vector<8x8xf32>
    %cst_42 = arith.constant dense<0xFF800000> : vector<8xf32>
    %76 = vector.multi_reduction <maximumf>, %75, %cst_42 [1] : vector<8x8xf32> to vector<8xf32>
    %77 = vector.shape_cast %76 : vector<8xf32> to vector<8x1xf32>
    %78 = vector.broadcast %77 : vector<8x1xf32> to vector<8x8xf32>
    %79 = arith.subf %75, %78 : vector<8x8xf32>
    %80 = math.exp %79 : vector<8x8xf32>
    %cst_43 = arith.constant dense<0.000000e+00> : vector<8xf32>
    %81 = vector.multi_reduction <add>, %80, %cst_43 [1] : vector<8x8xf32> to vector<8xf32>
    %82 = vector.shape_cast %81 : vector<8xf32> to vector<8x1xf32>
    %83 = tpu.reciprocal %82 : vector<8x1xf32> -> vector<8x1xf32>
    %84 = vector.broadcast %83 : vector<8x1xf32> to vector<8x8xf32>
    %85 = arith.mulf %80, %84 : vector<8x8xf32>
    %86 = arith.truncf %85 : vector<8x8xf32> to vector<8x8xbf16>
    %cst_44 = arith.constant dense<0.000000e+00> : vector<8x4xf32>
    %87 = tpu.matmul %86, %73, %cst_44 {dimension_numbers = #tpu.dot_dimension_numbers<[1], [0], [0], [1], [0, 0, 1, 1], [], []>} : vector<8x8xbf16>, vector<8x4xbf16>, vector<8x4xf32> -> vector<8x4xf32>
    %c8_45 = arith.constant 8 : index
    %c4_46 = arith.constant 4 : index
    %88 = vector.load %arg7[%c8_45, %c4_46] : memref<16x32xf32, #tpu.memory_space<vmem>>, vector<8x4xf32>
    tpu.vector_store %arg7[%c8_45, %c4_46], %87 {strides = array<i32>} : memref<16x32xf32, #tpu.memory_space<vmem>>, vector<8x4xf32>,
    %c0_47 = arith.constant 0 : index
    %c8_48 = arith.constant 8 : index
    %89 = vector.load %arg6[%c0_47, %c8_48] : memref<16x96xf32, #tpu.memory_space<vmem>>, vector<8x4xf32>
    %90 = arith.truncf %89 : vector<8x4xf32> to vector<8x4xbf16>
    %c0_49 = arith.constant 0 : index
    %c40 = arith.constant 40 : index
    %91 = vector.load %arg6[%c0_49, %c40] : memref<16x96xf32, #tpu.memory_space<vmem>>, vector<8x4xf32>
    %92 = arith.truncf %91 : vector<8x4xf32> to vector<8x4xbf16>
    %c0_50 = arith.constant 0 : index
    %c72 = arith.constant 72 : index
    %93 = vector.load %arg6[%c0_50, %c72] : memref<16x96xf32, #tpu.memory_space<vmem>>, vector<8x4xf32>
    %94 = arith.truncf %93 : vector<8x4xf32> to vector<8x4xbf16>
    %95 = tpu.transpose %92, [1, 0] : vector<8x4xbf16> -> vector<4x8xbf16>
    %cst_51 = arith.constant dense<0.000000e+00> : vector<8x8xf32>
    %96 = tpu.matmul %90, %95, %cst_51 {dimension_numbers = #tpu.dot_dimension_numbers<[1], [0], [0], [1], [0, 0, 1, 1], [], []>} : vector<8x4xbf16>, vector<4x8xbf16>, vector<8x8xf32> -> vector<8x8xf32>
    %cst_52 = arith.constant dense<0xFF800000> : vector<8xf32>
    %97 = vector.multi_reduction <maximumf>, %96, %cst_52 [1] : vector<8x8xf32> to vector<8xf32>
    %98 = vector.shape_cast %97 : vector<8xf32> to vector<8x1xf32>
    %99 = vector.broadcast %98 : vector<8x1xf32> to vector<8x8xf32>
    %100 = arith.subf %96, %99 : vector<8x8xf32>
    %101 = math.exp %100 : vector<8x8xf32>
    %cst_53 = arith.constant dense<0.000000e+00> : vector<8xf32>
    %102 = vector.multi_reduction <add>, %101, %cst_53 [1] : vector<8x8xf32> to vector<8xf32>
    %103 = vector.shape_cast %102 : vector<8xf32> to vector<8x1xf32>
    %104 = tpu.reciprocal %103 : vector<8x1xf32> -> vector<8x1xf32>
    %105 = vector.broadcast %104 : vector<8x1xf32> to vector<8x8xf32>
    %106 = arith.mulf %101, %105 : vector<8x8xf32>
    %107 = arith.truncf %106 : vector<8x8xf32> to vector<8x8xbf16>
    %cst_54 = arith.constant dense<0.000000e+00> : vector<8x4xf32>
    %108 = tpu.matmul %107, %94, %cst_54 {dimension_numbers = #tpu.dot_dimension_numbers<[1], [0], [0], [1], [0, 0, 1, 1], [], []>} : vector<8x8xbf16>, vector<8x4xbf16>, vector<8x4xf32> -> vector<8x4xf32>
    %c0_55 = arith.constant 0 : index
    %c8_56 = arith.constant 8 : index
    %109 = vector.load %arg7[%c0_55, %c8_56] : memref<16x32xf32, #tpu.memory_space<vmem>>, vector<8x4xf32>
    tpu.vector_store %arg7[%c0_55, %c8_56], %108 {strides = array<i32>} : memref<16x32xf32, #tpu.memory_space<vmem>>, vector<8x4xf32>,
    %c8_57 = arith.constant 8 : index
    %c8_58 = arith.constant 8 : index
    %110 = vector.load %arg6[%c8_57, %c8_58] : memref<16x96xf32, #tpu.memory_space<vmem>>, vector<8x4xf32>
    %111 = arith.truncf %110 : vector<8x4xf32> to vector<8x4xbf16>
    %c8_59 = arith.constant 8 : index
    %c40_60 = arith.constant 40 : index
    %112 = vector.load %arg6[%c8_59, %c40_60] : memref<16x96xf32, #tpu.memory_space<vmem>>, vector<8x4xf32>
    %113 = arith.truncf %112 : vector<8x4xf32> to vector<8x4xbf16>
    %c8_61 = arith.constant 8 : index
    %c72_62 = arith.constant 72 : index
    %114 = vector.load %arg6[%c8_61, %c72_62] : memref<16x96xf32, #tpu.memory_space<vmem>>, vector<8x4xf32>
    %115 = arith.truncf %114 : vector<8x4xf32> to vector<8x4xbf16>
    %116 = tpu.transpose %113, [1, 0] : vector<8x4xbf16> -> vector<4x8xbf16>
    %cst_63 = arith.constant dense<0.000000e+00> : vector<8x8xf32>
    %117 = tpu.matmul %111, %116, %cst_63 {dimension_numbers = #tpu.dot_dimension_numbers<[1], [0], [0], [1], [0, 0, 1, 1], [], []>} : vector<8x4xbf16>, vector<4x8xbf16>, vector<8x8xf32> -> vector<8x8xf32>
    %cst_64 = arith.constant dense<0xFF800000> : vector<8xf32>
    %118 = vector.multi_reduction <maximumf>, %117, %cst_64 [1] : vector<8x8xf32> to vector<8xf32>
    %119 = vector.shape_cast %118 : vector<8xf32> to vector<8x1xf32>
    %120 = vector.broadcast %119 : vector<8x1xf32> to vector<8x8xf32>
    %121 = arith.subf %117, %120 : vector<8x8xf32>
    %122 = math.exp %121 : vector<8x8xf32>
    %cst_65 = arith.constant dense<0.000000e+00> : vector<8xf32>
    %123 = vector.multi_reduction <add>, %122, %cst_65 [1] : vector<8x8xf32> to vector<8xf32>
    %124 = vector.shape_cast %123 : vector<8xf32> to vector<8x1xf32>
    %125 = tpu.reciprocal %124 : vector<8x1xf32> -> vector<8x1xf32>
    %126 = vector.broadcast %125 : vector<8x1xf32> to vector<8x8xf32>
    %127 = arith.mulf %122, %126 : vector<8x8xf32>
    %128 = arith.truncf %127 : vector<8x8xf32> to vector<8x8xbf16>
    %cst_66 = arith.constant dense<0.000000e+00> : vector<8x4xf32>
    %129 = tpu.matmul %128, %115, %cst_66 {dimension_numbers = #tpu.dot_dimension_numbers<[1], [0], [0], [1], [0, 0, 1, 1], [], []>} : vector<8x8xbf16>, vector<8x4xbf16>, vector<8x4xf32> -> vector<8x4xf32>
    %c8_67 = arith.constant 8 : index
    %c8_68 = arith.constant 8 : index
    %130 = vector.load %arg7[%c8_67, %c8_68] : memref<16x32xf32, #tpu.memory_space<vmem>>, vector<8x4xf32>
    tpu.vector_store %arg7[%c8_67, %c8_68], %129 {strides = array<i32>} : memref<16x32xf32, #tpu.memory_space<vmem>>, vector<8x4xf32>,
    %c0_69 = arith.constant 0 : index
    %c12 = arith.constant 12 : index
    %131 = vector.load %arg6[%c0_69, %c12] : memref<16x96xf32, #tpu.memory_space<vmem>>, vector<8x4xf32>
    %132 = arith.truncf %131 : vector<8x4xf32> to vector<8x4xbf16>
    %c0_70 = arith.constant 0 : index
    %c44 = arith.constant 44 : index
    %133 = vector.load %arg6[%c0_70, %c44] : memref<16x96xf32, #tpu.memory_space<vmem>>, vector<8x4xf32>
    %134 = arith.truncf %133 : vector<8x4xf32> to vector<8x4xbf16>
    %c0_71 = arith.constant 0 : index
    %c76 = arith.constant 76 : index
    %135 = vector.load %arg6[%c0_71, %c76] : memref<16x96xf32, #tpu.memory_space<vmem>>, vector<8x4xf32>
    %136 = arith.truncf %135 : vector<8x4xf32> to vector<8x4xbf16>
    %137 = tpu.transpose %134, [1, 0] : vector<8x4xbf16> -> vector<4x8xbf16>
    %cst_72 = arith.constant dense<0.000000e+00> : vector<8x8xf32>
    %138 = tpu.matmul %132, %137, %cst_72 {dimension_numbers = #tpu.dot_dimension_numbers<[1], [0], [0], [1], [0, 0, 1, 1], [], []>} : vector<8x4xbf16>, vector<4x8xbf16>, vector<8x8xf32> -> vector<8x8xf32>
    %cst_73 = arith.constant dense<0xFF800000> : vector<8xf32>
    %139 = vector.multi_reduction <maximumf>, %138, %cst_73 [1] : vector<8x8xf32> to vector<8xf32>
    %140 = vector.shape_cast %139 : vector<8xf32> to vector<8x1xf32>
    %141 = vector.broadcast %140 : vector<8x1xf32> to vector<8x8xf32>
    %142 = arith.subf %138, %141 : vector<8x8xf32>
    %143 = math.exp %142 : vector<8x8xf32>
    %cst_74 = arith.constant dense<0.000000e+00> : vector<8xf32>
    %144 = vector.multi_reduction <add>, %143, %cst_74 [1] : vector<8x8xf32> to vector<8xf32>
    %145 = vector.shape_cast %144 : vector<8xf32> to vector<8x1xf32>
    %146 = tpu.reciprocal %145 : vector<8x1xf32> -> vector<8x1xf32>
    %147 = vector.broadcast %146 : vector<8x1xf32> to vector<8x8xf32>
    %148 = arith.mulf %143, %147 : vector<8x8xf32>
    %149 = arith.truncf %148 : vector<8x8xf32> to vector<8x8xbf16>
    %cst_75 = arith.constant dense<0.000000e+00> : vector<8x4xf32>
    %150 = tpu.matmul %149, %136, %cst_75 {dimension_numbers = #tpu.dot_dimension_numbers<[1], [0], [0], [1], [0, 0, 1, 1], [], []>} : vector<8x8xbf16>, vector<8x4xbf16>, vector<8x4xf32> -> vector<8x4xf32>
    %c0_76 = arith.constant 0 : index
    %c12_77 = arith.constant 12 : index
    %151 = vector.load %arg7[%c0_76, %c12_77] : memref<16x32xf32, #tpu.memory_space<vmem>>, vector<8x4xf32>
    tpu.vector_store %arg7[%c0_76, %c12_77], %150 {strides = array<i32>} : memref<16x32xf32, #tpu.memory_space<vmem>>, vector<8x4xf32>,
    %c8_78 = arith.constant 8 : index
    %c12_79 = arith.constant 12 : index
    %152 = vector.load %arg6[%c8_78, %c12_79] : memref<16x96xf32, #tpu.memory_space<vmem>>, vector<8x4xf32>
    %153 = arith.truncf %152 : vector<8x4xf32> to vector<8x4xbf16>
    %c8_80 = arith.constant 8 : index
    %c44_81 = arith.constant 44 : index
    %154 = vector.load %arg6[%c8_80, %c44_81] : memref<16x96xf32, #tpu.memory_space<vmem>>, vector<8x4xf32>
    %155 = arith.truncf %154 : vector<8x4xf32> to vector<8x4xbf16>
    %c8_82 = arith.constant 8 : index
    %c76_83 = arith.constant 76 : index
    %156 = vector.load %arg6[%c8_82, %c76_83] : memref<16x96xf32, #tpu.memory_space<vmem>>, vector<8x4xf32>
    %157 = arith.truncf %156 : vector<8x4xf32> to vector<8x4xbf16>
    %158 = tpu.transpose %155, [1, 0] : vector<8x4xbf16> -> vector<4x8xbf16>
    %cst_84 = arith.constant dense<0.000000e+00> : vector<8x8xf32>
    %159 = tpu.matmul %153, %158, %cst_84 {dimension_numbers = #tpu.dot_dimension_numbers<[1], [0], [0], [1], [0, 0, 1, 1], [], []>} : vector<8x4xbf16>, vector<4x8xbf16>, vector<8x8xf32> -> vector<8x8xf32>
    %cst_85 = arith.constant dense<0xFF800000> : vector<8xf32>
    %160 = vector.multi_reduction <maximumf>, %159, %cst_85 [1] : vector<8x8xf32> to vector<8xf32>
    %161 = vector.shape_cast %160 : vector<8xf32> to vector<8x1xf32>
    %162 = vector.broadcast %161 : vector<8x1xf32> to vector<8x8xf32>
    %163 = arith.subf %159, %162 : vector<8x8xf32>
    %164 = math.exp %163 : vector<8x8xf32>
    %cst_86 = arith.constant dense<0.000000e+00> : vector<8xf32>
    %165 = vector.multi_reduction <add>, %164, %cst_86 [1] : vector<8x8xf32> to vector<8xf32>
    %166 = vector.shape_cast %165 : vector<8xf32> to vector<8x1xf32>
    %167 = tpu.reciprocal %166 : vector<8x1xf32> -> vector<8x1xf32>
    %168 = vector.broadcast %167 : vector<8x1xf32> to vector<8x8xf32>
    %169 = arith.mulf %164, %168 : vector<8x8xf32>
    %170 = arith.truncf %169 : vector<8x8xf32> to vector<8x8xbf16>
    %cst_87 = arith.constant dense<0.000000e+00> : vector<8x4xf32>
    %171 = tpu.matmul %170, %157, %cst_87 {dimension_numbers = #tpu.dot_dimension_numbers<[1], [0], [0], [1], [0, 0, 1, 1], [], []>} : vector<8x8xbf16>, vector<8x4xbf16>, vector<8x4xf32> -> vector<8x4xf32>
    %c8_88 = arith.constant 8 : index
    %c12_89 = arith.constant 12 : index
    %172 = vector.load %arg7[%c8_88, %c12_89] : memref<16x32xf32, #tpu.memory_space<vmem>>, vector<8x4xf32>
    tpu.vector_store %arg7[%c8_88, %c12_89], %171 {strides = array<i32>} : memref<16x32xf32, #tpu.memory_space<vmem>>, vector<8x4xf32>,
    %c0_90 = arith.constant 0 : index
    %c16 = arith.constant 16 : index
    %173 = vector.load %arg6[%c0_90, %c16] : memref<16x96xf32, #tpu.memory_space<vmem>>, vector<8x4xf32>
    %174 = arith.truncf %173 : vector<8x4xf32> to vector<8x4xbf16>
    %c0_91 = arith.constant 0 : index
    %c48 = arith.constant 48 : index
    %175 = vector.load %arg6[%c0_91, %c48] : memref<16x96xf32, #tpu.memory_space<vmem>>, vector<8x4xf32>
    %176 = arith.truncf %175 : vector<8x4xf32> to vector<8x4xbf16>
    %c0_92 = arith.constant 0 : index
    %c80 = arith.constant 80 : index
    %177 = vector.load %arg6[%c0_92, %c80] : memref<16x96xf32, #tpu.memory_space<vmem>>, vector<8x4xf32>
    %178 = arith.truncf %177 : vector<8x4xf32> to vector<8x4xbf16>
    %179 = tpu.transpose %176, [1, 0] : vector<8x4xbf16> -> vector<4x8xbf16>
    %cst_93 = arith.constant dense<0.000000e+00> : vector<8x8xf32>
    %180 = tpu.matmul %174, %179, %cst_93 {dimension_numbers = #tpu.dot_dimension_numbers<[1], [0], [0], [1], [0, 0, 1, 1], [], []>} : vector<8x4xbf16>, vector<4x8xbf16>, vector<8x8xf32> -> vector<8x8xf32>
    %cst_94 = arith.constant dense<0xFF800000> : vector<8xf32>
    %181 = vector.multi_reduction <maximumf>, %180, %cst_94 [1] : vector<8x8xf32> to vector<8xf32>
    %182 = vector.shape_cast %181 : vector<8xf32> to vector<8x1xf32>
    %183 = vector.broadcast %182 : vector<8x1xf32> to vector<8x8xf32>
    %184 = arith.subf %180, %183 : vector<8x8xf32>
    %185 = math.exp %184 : vector<8x8xf32>
    %cst_95 = arith.constant dense<0.000000e+00> : vector<8xf32>
    %186 = vector.multi_reduction <add>, %185, %cst_95 [1] : vector<8x8xf32> to vector<8xf32>
    %187 = vector.shape_cast %186 : vector<8xf32> to vector<8x1xf32>
    %188 = tpu.reciprocal %187 : vector<8x1xf32> -> vector<8x1xf32>
    %189 = vector.broadcast %188 : vector<8x1xf32> to vector<8x8xf32>
    %190 = arith.mulf %185, %189 : vector<8x8xf32>
    %191 = arith.truncf %190 : vector<8x8xf32> to vector<8x8xbf16>
    %cst_96 = arith.constant dense<0.000000e+00> : vector<8x4xf32>
    %192 = tpu.matmul %191, %178, %cst_96 {dimension_numbers = #tpu.dot_dimension_numbers<[1], [0], [0], [1], [0, 0, 1, 1], [], []>} : vector<8x8xbf16>, vector<8x4xbf16>, vector<8x4xf32> -> vector<8x4xf32>
    %c0_97 = arith.constant 0 : index
    %c16_98 = arith.constant 16 : index
    %193 = vector.load %arg7[%c0_97, %c16_98] : memref<16x32xf32, #tpu.memory_space<vmem>>, vector<8x4xf32>
    tpu.vector_store %arg7[%c0_97, %c16_98], %192 {strides = array<i32>} : memref<16x32xf32, #tpu.memory_space<vmem>>, vector<8x4xf32>,
    %c8_99 = arith.constant 8 : index
    %c16_100 = arith.constant 16 : index
    %194 = vector.load %arg6[%c8_99, %c16_100] : memref<16x96xf32, #tpu.memory_space<vmem>>, vector<8x4xf32>
    %195 = arith.truncf %194 : vector<8x4xf32> to vector<8x4xbf16>
    %c8_101 = arith.constant 8 : index
    %c48_102 = arith.constant 48 : index
    %196 = vector.load %arg6[%c8_101, %c48_102] : memref<16x96xf32, #tpu.memory_space<vmem>>, vector<8x4xf32>
    %197 = arith.truncf %196 : vector<8x4xf32> to vector<8x4xbf16>
    %c8_103 = arith.constant 8 : index
    %c80_104 = arith.constant 80 : index
    %198 = vector.load %arg6[%c8_103, %c80_104] : memref<16x96xf32, #tpu.memory_space<vmem>>, vector<8x4xf32>
    %199 = arith.truncf %198 : vector<8x4xf32> to vector<8x4xbf16>
    %200 = tpu.transpose %197, [1, 0] : vector<8x4xbf16> -> vector<4x8xbf16>
    %cst_105 = arith.constant dense<0.000000e+00> : vector<8x8xf32>
    %201 = tpu.matmul %195, %200, %cst_105 {dimension_numbers = #tpu.dot_dimension_numbers<[1], [0], [0], [1], [0, 0, 1, 1], [], []>} : vector<8x4xbf16>, vector<4x8xbf16>, vector<8x8xf32> -> vector<8x8xf32>
    %cst_106 = arith.constant dense<0xFF800000> : vector<8xf32>
    %202 = vector.multi_reduction <maximumf>, %201, %cst_106 [1] : vector<8x8xf32> to vector<8xf32>
    %203 = vector.shape_cast %202 : vector<8xf32> to vector<8x1xf32>
    %204 = vector.broadcast %203 : vector<8x1xf32> to vector<8x8xf32>
    %205 = arith.subf %201, %204 : vector<8x8xf32>
    %206 = math.exp %205 : vector<8x8xf32>
    %cst_107 = arith.constant dense<0.000000e+00> : vector<8xf32>
    %207 = vector.multi_reduction <add>, %206, %cst_107 [1] : vector<8x8xf32> to vector<8xf32>
    %208 = vector.shape_cast %207 : vector<8xf32> to vector<8x1xf32>
    %209 = tpu.reciprocal %208 : vector<8x1xf32> -> vector<8x1xf32>
    %210 = vector.broadcast %209 : vector<8x1xf32> to vector<8x8xf32>
    %211 = arith.mulf %206, %210 : vector<8x8xf32>
    %212 = arith.truncf %211 : vector<8x8xf32> to vector<8x8xbf16>
    %cst_108 = arith.constant dense<0.000000e+00> : vector<8x4xf32>
    %213 = tpu.matmul %212, %199, %cst_108 {dimension_numbers = #tpu.dot_dimension_numbers<[1], [0], [0], [1], [0, 0, 1, 1], [], []>} : vector<8x8xbf16>, vector<8x4xbf16>, vector<8x4xf32> -> vector<8x4xf32>
    %c8_109 = arith.constant 8 : index
    %c16_110 = arith.constant 16 : index
    %214 = vector.load %arg7[%c8_109, %c16_110] : memref<16x32xf32, #tpu.memory_space<vmem>>, vector<8x4xf32>
    tpu.vector_store %arg7[%c8_109, %c16_110], %213 {strides = array<i32>} : memref<16x32xf32, #tpu.memory_space<vmem>>, vector<8x4xf32>,
    %c0_111 = arith.constant 0 : index
    %c20 = arith.constant 20 : index
    %215 = vector.load %arg6[%c0_111, %c20] : memref<16x96xf32, #tpu.memory_space<vmem>>, vector<8x4xf32>
    %216 = arith.truncf %215 : vector<8x4xf32> to vector<8x4xbf16>
    %c0_112 = arith.constant 0 : index
    %c52 = arith.constant 52 : index
    %217 = vector.load %arg6[%c0_112, %c52] : memref<16x96xf32, #tpu.memory_space<vmem>>, vector<8x4xf32>
    %218 = arith.truncf %217 : vector<8x4xf32> to vector<8x4xbf16>
    %c0_113 = arith.constant 0 : index
    %c84 = arith.constant 84 : index
    %219 = vector.load %arg6[%c0_113, %c84] : memref<16x96xf32, #tpu.memory_space<vmem>>, vector<8x4xf32>
    %220 = arith.truncf %219 : vector<8x4xf32> to vector<8x4xbf16>
    %221 = tpu.transpose %218, [1, 0] : vector<8x4xbf16> -> vector<4x8xbf16>
    %cst_114 = arith.constant dense<0.000000e+00> : vector<8x8xf32>
    %222 = tpu.matmul %216, %221, %cst_114 {dimension_numbers = #tpu.dot_dimension_numbers<[1], [0], [0], [1], [0, 0, 1, 1], [], []>} : vector<8x4xbf16>, vector<4x8xbf16>, vector<8x8xf32> -> vector<8x8xf32>
    %cst_115 = arith.constant dense<0xFF800000> : vector<8xf32>
    %223 = vector.multi_reduction <maximumf>, %222, %cst_115 [1] : vector<8x8xf32> to vector<8xf32>
    %224 = vector.shape_cast %223 : vector<8xf32> to vector<8x1xf32>
    %225 = vector.broadcast %224 : vector<8x1xf32> to vector<8x8xf32>
    %226 = arith.subf %222, %225 : vector<8x8xf32>
    %227 = math.exp %226 : vector<8x8xf32>
    %cst_116 = arith.constant dense<0.000000e+00> : vector<8xf32>
    %228 = vector.multi_reduction <add>, %227, %cst_116 [1] : vector<8x8xf32> to vector<8xf32>
    %229 = vector.shape_cast %228 : vector<8xf32> to vector<8x1xf32>
    %230 = tpu.reciprocal %229 : vector<8x1xf32> -> vector<8x1xf32>
    %231 = vector.broadcast %230 : vector<8x1xf32> to vector<8x8xf32>
    %232 = arith.mulf %227, %231 : vector<8x8xf32>
    %233 = arith.truncf %232 : vector<8x8xf32> to vector<8x8xbf16>
    %cst_117 = arith.constant dense<0.000000e+00> : vector<8x4xf32>
    %234 = tpu.matmul %233, %220, %cst_117 {dimension_numbers = #tpu.dot_dimension_numbers<[1], [0], [0], [1], [0, 0, 1, 1], [], []>} : vector<8x8xbf16>, vector<8x4xbf16>, vector<8x4xf32> -> vector<8x4xf32>
    %c0_118 = arith.constant 0 : index
    %c20_119 = arith.constant 20 : index
    %235 = vector.load %arg7[%c0_118, %c20_119] : memref<16x32xf32, #tpu.memory_space<vmem>>, vector<8x4xf32>
    tpu.vector_store %arg7[%c0_118, %c20_119], %234 {strides = array<i32>} : memref<16x32xf32, #tpu.memory_space<vmem>>, vector<8x4xf32>,
    %c8_120 = arith.constant 8 : index
    %c20_121 = arith.constant 20 : index
    %236 = vector.load %arg6[%c8_120, %c20_121] : memref<16x96xf32, #tpu.memory_space<vmem>>, vector<8x4xf32>
    %237 = arith.truncf %236 : vector<8x4xf32> to vector<8x4xbf16>
    %c8_122 = arith.constant 8 : index
    %c52_123 = arith.constant 52 : index
    %238 = vector.load %arg6[%c8_122, %c52_123] : memref<16x96xf32, #tpu.memory_space<vmem>>, vector<8x4xf32>
    %239 = arith.truncf %238 : vector<8x4xf32> to vector<8x4xbf16>
    %c8_124 = arith.constant 8 : index
    %c84_125 = arith.constant 84 : index
    %240 = vector.load %arg6[%c8_124, %c84_125] : memref<16x96xf32, #tpu.memory_space<vmem>>, vector<8x4xf32>
    %241 = arith.truncf %240 : vector<8x4xf32> to vector<8x4xbf16>
    %242 = tpu.transpose %239, [1, 0] : vector<8x4xbf16> -> vector<4x8xbf16>
    %cst_126 = arith.constant dense<0.000000e+00> : vector<8x8xf32>
    %243 = tpu.matmul %237, %242, %cst_126 {dimension_numbers = #tpu.dot_dimension_numbers<[1], [0], [0], [1], [0, 0, 1, 1], [], []>} : vector<8x4xbf16>, vector<4x8xbf16>, vector<8x8xf32> -> vector<8x8xf32>
    %cst_127 = arith.constant dense<0xFF800000> : vector<8xf32>
    %244 = vector.multi_reduction <maximumf>, %243, %cst_127 [1] : vector<8x8xf32> to vector<8xf32>
    %245 = vector.shape_cast %244 : vector<8xf32> to vector<8x1xf32>
    %246 = vector.broadcast %245 : vector<8x1xf32> to vector<8x8xf32>
    %247 = arith.subf %243, %246 : vector<8x8xf32>
    %248 = math.exp %247 : vector<8x8xf32>
    %cst_128 = arith.constant dense<0.000000e+00> : vector<8xf32>
    %249 = vector.multi_reduction <add>, %248, %cst_128 [1] : vector<8x8xf32> to vector<8xf32>
    %250 = vector.shape_cast %249 : vector<8xf32> to vector<8x1xf32>
    %251 = tpu.reciprocal %250 : vector<8x1xf32> -> vector<8x1xf32>
    %252 = vector.broadcast %251 : vector<8x1xf32> to vector<8x8xf32>
    %253 = arith.mulf %248, %252 : vector<8x8xf32>
    %254 = arith.truncf %253 : vector<8x8xf32> to vector<8x8xbf16>
    %cst_129 = arith.constant dense<0.000000e+00> : vector<8x4xf32>
    %255 = tpu.matmul %254, %241, %cst_129 {dimension_numbers = #tpu.dot_dimension_numbers<[1], [0], [0], [1], [0, 0, 1, 1], [], []>} : vector<8x8xbf16>, vector<8x4xbf16>, vector<8x4xf32> -> vector<8x4xf32>
    %c8_130 = arith.constant 8 : index
    %c20_131 = arith.constant 20 : index
    %256 = vector.load %arg7[%c8_130, %c20_131] : memref<16x32xf32, #tpu.memory_space<vmem>>, vector<8x4xf32>
    tpu.vector_store %arg7[%c8_130, %c20_131], %255 {strides = array<i32>} : memref<16x32xf32, #tpu.memory_space<vmem>>, vector<8x4xf32>,
    %c0_132 = arith.constant 0 : index
    %c24 = arith.constant 24 : index
    %257 = vector.load %arg6[%c0_132, %c24] : memref<16x96xf32, #tpu.memory_space<vmem>>, vector<8x4xf32>
    %258 = arith.truncf %257 : vector<8x4xf32> to vector<8x4xbf16>
    %c0_133 = arith.constant 0 : index
    %c56 = arith.constant 56 : index
    %259 = vector.load %arg6[%c0_133, %c56] : memref<16x96xf32, #tpu.memory_space<vmem>>, vector<8x4xf32>
    %260 = arith.truncf %259 : vector<8x4xf32> to vector<8x4xbf16>
    %c0_134 = arith.constant 0 : index
    %c88 = arith.constant 88 : index
    %261 = vector.load %arg6[%c0_134, %c88] : memref<16x96xf32, #tpu.memory_space<vmem>>, vector<8x4xf32>
    %262 = arith.truncf %261 : vector<8x4xf32> to vector<8x4xbf16>
    %263 = tpu.transpose %260, [1, 0] : vector<8x4xbf16> -> vector<4x8xbf16>
    %cst_135 = arith.constant dense<0.000000e+00> : vector<8x8xf32>
    %264 = tpu.matmul %258, %263, %cst_135 {dimension_numbers = #tpu.dot_dimension_numbers<[1], [0], [0], [1], [0, 0, 1, 1], [], []>} : vector<8x4xbf16>, vector<4x8xbf16>, vector<8x8xf32> -> vector<8x8xf32>
    %cst_136 = arith.constant dense<0xFF800000> : vector<8xf32>
    %265 = vector.multi_reduction <maximumf>, %264, %cst_136 [1] : vector<8x8xf32> to vector<8xf32>
    %266 = vector.shape_cast %265 : vector<8xf32> to vector<8x1xf32>
    %267 = vector.broadcast %266 : vector<8x1xf32> to vector<8x8xf32>
    %268 = arith.subf %264, %267 : vector<8x8xf32>
    %269 = math.exp %268 : vector<8x8xf32>
    %cst_137 = arith.constant dense<0.000000e+00> : vector<8xf32>
    %270 = vector.multi_reduction <add>, %269, %cst_137 [1] : vector<8x8xf32> to vector<8xf32>
    %271 = vector.shape_cast %270 : vector<8xf32> to vector<8x1xf32>
    %272 = tpu.reciprocal %271 : vector<8x1xf32> -> vector<8x1xf32>
    %273 = vector.broadcast %272 : vector<8x1xf32> to vector<8x8xf32>
    %274 = arith.mulf %269, %273 : vector<8x8xf32>
    %275 = arith.truncf %274 : vector<8x8xf32> to vector<8x8xbf16>
    %cst_138 = arith.constant dense<0.000000e+00> : vector<8x4xf32>
    %276 = tpu.matmul %275, %262, %cst_138 {dimension_numbers = #tpu.dot_dimension_numbers<[1], [0], [0], [1], [0, 0, 1, 1], [], []>} : vector<8x8xbf16>, vector<8x4xbf16>, vector<8x4xf32> -> vector<8x4xf32>
    %c0_139 = arith.constant 0 : index
    %c24_140 = arith.constant 24 : index
    %277 = vector.load %arg7[%c0_139, %c24_140] : memref<16x32xf32, #tpu.memory_space<vmem>>, vector<8x4xf32>
    tpu.vector_store %arg7[%c0_139, %c24_140], %276 {strides = array<i32>} : memref<16x32xf32, #tpu.memory_space<vmem>>, vector<8x4xf32>,
    %c8_141 = arith.constant 8 : index
    %c24_142 = arith.constant 24 : index
    %278 = vector.load %arg6[%c8_141, %c24_142] : memref<16x96xf32, #tpu.memory_space<vmem>>, vector<8x4xf32>
    %279 = arith.truncf %278 : vector<8x4xf32> to vector<8x4xbf16>
    %c8_143 = arith.constant 8 : index
    %c56_144 = arith.constant 56 : index
    %280 = vector.load %arg6[%c8_143, %c56_144] : memref<16x96xf32, #tpu.memory_space<vmem>>, vector<8x4xf32>
    %281 = arith.truncf %280 : vector<8x4xf32> to vector<8x4xbf16>
    %c8_145 = arith.constant 8 : index
    %c88_146 = arith.constant 88 : index
    %282 = vector.load %arg6[%c8_145, %c88_146] : memref<16x96xf32, #tpu.memory_space<vmem>>, vector<8x4xf32>
    %283 = arith.truncf %282 : vector<8x4xf32> to vector<8x4xbf16>
    %284 = tpu.transpose %281, [1, 0] : vector<8x4xbf16> -> vector<4x8xbf16>
    %cst_147 = arith.constant dense<0.000000e+00> : vector<8x8xf32>
    %285 = tpu.matmul %279, %284, %cst_147 {dimension_numbers = #tpu.dot_dimension_numbers<[1], [0], [0], [1], [0, 0, 1, 1], [], []>} : vector<8x4xbf16>, vector<4x8xbf16>, vector<8x8xf32> -> vector<8x8xf32>
    %cst_148 = arith.constant dense<0xFF800000> : vector<8xf32>
    %286 = vector.multi_reduction <maximumf>, %285, %cst_148 [1] : vector<8x8xf32> to vector<8xf32>
    %287 = vector.shape_cast %286 : vector<8xf32> to vector<8x1xf32>
    %288 = vector.broadcast %287 : vector<8x1xf32> to vector<8x8xf32>
    %289 = arith.subf %285, %288 : vector<8x8xf32>
    %290 = math.exp %289 : vector<8x8xf32>
    %cst_149 = arith.constant dense<0.000000e+00> : vector<8xf32>
    %291 = vector.multi_reduction <add>, %290, %cst_149 [1] : vector<8x8xf32> to vector<8xf32>
    %292 = vector.shape_cast %291 : vector<8xf32> to vector<8x1xf32>
    %293 = tpu.reciprocal %292 : vector<8x1xf32> -> vector<8x1xf32>
    %294 = vector.broadcast %293 : vector<8x1xf32> to vector<8x8xf32>
    %295 = arith.mulf %290, %294 : vector<8x8xf32>
    %296 = arith.truncf %295 : vector<8x8xf32> to vector<8x8xbf16>
    %cst_150 = arith.constant dense<0.000000e+00> : vector<8x4xf32>
    %297 = tpu.matmul %296, %283, %cst_150 {dimension_numbers = #tpu.dot_dimension_numbers<[1], [0], [0], [1], [0, 0, 1, 1], [], []>} : vector<8x8xbf16>, vector<8x4xbf16>, vector<8x4xf32> -> vector<8x4xf32>
    %c8_151 = arith.constant 8 : index
    %c24_152 = arith.constant 24 : index
    %298 = vector.load %arg7[%c8_151, %c24_152] : memref<16x32xf32, #tpu.memory_space<vmem>>, vector<8x4xf32>
    tpu.vector_store %arg7[%c8_151, %c24_152], %297 {strides = array<i32>} : memref<16x32xf32, #tpu.memory_space<vmem>>, vector<8x4xf32>,
    %c0_153 = arith.constant 0 : index
    %c28 = arith.constant 28 : index
    %299 = vector.load %arg6[%c0_153, %c28] : memref<16x96xf32, #tpu.memory_space<vmem>>, vector<8x4xf32>
    %300 = arith.truncf %299 : vector<8x4xf32> to vector<8x4xbf16>
    %c0_154 = arith.constant 0 : index
    %c60 = arith.constant 60 : index
    %301 = vector.load %arg6[%c0_154, %c60] : memref<16x96xf32, #tpu.memory_space<vmem>>, vector<8x4xf32>
    %302 = arith.truncf %301 : vector<8x4xf32> to vector<8x4xbf16>
    %c0_155 = arith.constant 0 : index
    %c92 = arith.constant 92 : index
    %303 = vector.load %arg6[%c0_155, %c92] : memref<16x96xf32, #tpu.memory_space<vmem>>, vector<8x4xf32>
    %304 = arith.truncf %303 : vector<8x4xf32> to vector<8x4xbf16>
    %305 = tpu.transpose %302, [1, 0] : vector<8x4xbf16> -> vector<4x8xbf16>
    %cst_156 = arith.constant dense<0.000000e+00> : vector<8x8xf32>
    %306 = tpu.matmul %300, %305, %cst_156 {dimension_numbers = #tpu.dot_dimension_numbers<[1], [0], [0], [1], [0, 0, 1, 1], [], []>} : vector<8x4xbf16>, vector<4x8xbf16>, vector<8x8xf32> -> vector<8x8xf32>
    %cst_157 = arith.constant dense<0xFF800000> : vector<8xf32>
    %307 = vector.multi_reduction <maximumf>, %306, %cst_157 [1] : vector<8x8xf32> to vector<8xf32>
    %308 = vector.shape_cast %307 : vector<8xf32> to vector<8x1xf32>
    %309 = vector.broadcast %308 : vector<8x1xf32> to vector<8x8xf32>
    %310 = arith.subf %306, %309 : vector<8x8xf32>
    %311 = math.exp %310 : vector<8x8xf32>
    %cst_158 = arith.constant dense<0.000000e+00> : vector<8xf32>
    %312 = vector.multi_reduction <add>, %311, %cst_158 [1] : vector<8x8xf32> to vector<8xf32>
    %313 = vector.shape_cast %312 : vector<8xf32> to vector<8x1xf32>
    %314 = tpu.reciprocal %313 : vector<8x1xf32> -> vector<8x1xf32>
    %315 = vector.broadcast %314 : vector<8x1xf32> to vector<8x8xf32>
    %316 = arith.mulf %311, %315 : vector<8x8xf32>
    %317 = arith.truncf %316 : vector<8x8xf32> to vector<8x8xbf16>
    %cst_159 = arith.constant dense<0.000000e+00> : vector<8x4xf32>
    %318 = tpu.matmul %317, %304, %cst_159 {dimension_numbers = #tpu.dot_dimension_numbers<[1], [0], [0], [1], [0, 0, 1, 1], [], []>} : vector<8x8xbf16>, vector<8x4xbf16>, vector<8x4xf32> -> vector<8x4xf32>
    %c0_160 = arith.constant 0 : index
    %c28_161 = arith.constant 28 : index
    %319 = vector.load %arg7[%c0_160, %c28_161] : memref<16x32xf32, #tpu.memory_space<vmem>>, vector<8x4xf32>
    tpu.vector_store %arg7[%c0_160, %c28_161], %318 {strides = array<i32>} : memref<16x32xf32, #tpu.memory_space<vmem>>, vector<8x4xf32>,
    %c8_162 = arith.constant 8 : index
    %c28_163 = arith.constant 28 : index
    %320 = vector.load %arg6[%c8_162, %c28_163] : memref<16x96xf32, #tpu.memory_space<vmem>>, vector<8x4xf32>
    %321 = arith.truncf %320 : vector<8x4xf32> to vector<8x4xbf16>
    %c8_164 = arith.constant 8 : index
    %c60_165 = arith.constant 60 : index
    %322 = vector.load %arg6[%c8_164, %c60_165] : memref<16x96xf32, #tpu.memory_space<vmem>>, vector<8x4xf32>
    %323 = arith.truncf %322 : vector<8x4xf32> to vector<8x4xbf16>
    %c8_166 = arith.constant 8 : index
    %c92_167 = arith.constant 92 : index
    %324 = vector.load %arg6[%c8_166, %c92_167] : memref<16x96xf32, #tpu.memory_space<vmem>>, vector<8x4xf32>
    %325 = arith.truncf %324 : vector<8x4xf32> to vector<8x4xbf16>
    %326 = tpu.transpose %323, [1, 0] : vector<8x4xbf16> -> vector<4x8xbf16>
    %cst_168 = arith.constant dense<0.000000e+00> : vector<8x8xf32>
    %327 = tpu.matmul %321, %326, %cst_168 {dimension_numbers = #tpu.dot_dimension_numbers<[1], [0], [0], [1], [0, 0, 1, 1], [], []>} : vector<8x4xbf16>, vector<4x8xbf16>, vector<8x8xf32> -> vector<8x8xf32>
    %cst_169 = arith.constant dense<0xFF800000> : vector<8xf32>
    %328 = vector.multi_reduction <maximumf>, %327, %cst_169 [1] : vector<8x8xf32> to vector<8xf32>
    %329 = vector.shape_cast %328 : vector<8xf32> to vector<8x1xf32>
    %330 = vector.broadcast %329 : vector<8x1xf32> to vector<8x8xf32>
    %331 = arith.subf %327, %330 : vector<8x8xf32>
    %332 = math.exp %331 : vector<8x8xf32>
    %cst_170 = arith.constant dense<0.000000e+00> : vector<8xf32>
    %333 = vector.multi_reduction <add>, %332, %cst_170 [1] : vector<8x8xf32> to vector<8xf32>
    %334 = vector.shape_cast %333 : vector<8xf32> to vector<8x1xf32>
    %335 = tpu.reciprocal %334 : vector<8x1xf32> -> vector<8x1xf32>
    %336 = vector.broadcast %335 : vector<8x1xf32> to vector<8x8xf32>
    %337 = arith.mulf %332, %336 : vector<8x8xf32>
    %338 = arith.truncf %337 : vector<8x8xf32> to vector<8x8xbf16>
    %cst_171 = arith.constant dense<0.000000e+00> : vector<8x4xf32>
    %339 = tpu.matmul %338, %325, %cst_171 {dimension_numbers = #tpu.dot_dimension_numbers<[1], [0], [0], [1], [0, 0, 1, 1], [], []>} : vector<8x8xbf16>, vector<8x4xbf16>, vector<8x4xf32> -> vector<8x4xf32>
    %c8_172 = arith.constant 8 : index
    %c28_173 = arith.constant 28 : index
    %340 = vector.load %arg7[%c8_172, %c28_173] : memref<16x32xf32, #tpu.memory_space<vmem>>, vector<8x4xf32>
    tpu.vector_store %arg7[%c8_172, %c28_173], %339 {strides = array<i32>} : memref<16x32xf32, #tpu.memory_space<vmem>>, vector<8x4xf32>,
    %c0_174 = arith.constant 0 : index
    %c0_175 = arith.constant 0 : index
    %341 = vector.load %arg7[%c0_174, %c0_175] : memref<16x32xf32, #tpu.memory_space<vmem>>, vector<16x32xf32>
    %342 = arith.truncf %341 : vector<16x32xf32> to vector<16x32xbf16>
    %c0_176 = arith.constant 0 : index
    %c0_177 = arith.constant 0 : index
    %343 = vector.load %arg3[%c0_176, %c0_177] : memref<32x32xbf16, #tpu.memory_space<vmem>>, vector<32x32xbf16>
    %cst_178 = arith.constant dense<0.000000e+00> : vector<16x32xf32>
    %344 = tpu.matmul %342, %343, %cst_178 {dimension_numbers = #tpu.dot_dimension_numbers<[1], [0], [0], [1], [0, 0, 1, 1], [], []>} : vector<16x32xbf16>, vector<32x32xbf16>, vector<16x32xf32> -> vector<16x32xf32>
    %c0_179 = arith.constant 0 : index
    %c0_180 = arith.constant 0 : index
    %345 = vector.load %arg4[%c0_179, %c0_180] : memref<1x32xf32, #tpu.memory_space<vmem>>, vector<1x32xf32>
    %346 = vector.broadcast %345 : vector<1x32xf32> to vector<16x32xf32>
    %347 = arith.addf %344, %346 : vector<16x32xf32>
    %c0_181 = arith.constant 0 : index
    %c0_182 = arith.constant 0 : index
    %348 = vector.load %arg5[%c0_181, %c0_182] : memref<16x32xf32, #tpu.memory_space<vmem>>, vector<16x32xf32>
    tpu.vector_store %arg5[%c0_181, %c0_182], %347 {strides = array<i32>} : memref<16x32xf32, #tpu.memory_space<vmem>>, vector<16x32xf32>,
    return
  }
  func.func @transform_0(%arg0: i32) -> (i32, i32) {
    %c0_i32 = arith.constant 0 : i32
    %c0_i32_0 = arith.constant 0 : i32
    return %arg0, %c0_i32 : i32, i32
  }
  func.func @transform_1(%arg0: i32) -> (i32, i32) {
    %c0_i32 = arith.constant 0 : i32
    %c0_i32_0 = arith.constant 0 : i32
    %c0_i32_1 = arith.constant 0 : i32
    return %c0_i32, %c0_i32_0 : i32, i32
  }
  func.func @transform_2(%arg0: i32) -> (i32, i32) {
    %c0_i32 = arith.constant 0 : i32
    %c0_i32_0 = arith.constant 0 : i32
    %c0_i32_1 = arith.constant 0 : i32
    return %c0_i32, %c0_i32_0 : i32, i32
  }
  func.func @transform_3(%arg0: i32) -> (i32, i32) {
    %c0_i32 = arith.constant 0 : i32
    %c0_i32_0 = arith.constant 0 : i32
    %c0_i32_1 = arith.constant 0 : i32
    return %c0_i32, %c0_i32_0 : i32, i32
  }
  func.func @transform_4(%arg0: i32) -> (i32, i32) {
    %c0_i32 = arith.constant 0 : i32
    %c0_i32_0 = arith.constant 0 : i32
    return %arg0, %c0_i32 : i32, i32
  }
}

</mosaic_0001>

<bundles_post_ra>
// kernel: tpu_custom_call.1
= control target key start
LH: loop header
LB: loop body
LE: loop exit
PB: predicated region body
PF: predicated region fallthrough
CT: control target
= control target key end

     0   :  { %9 = vsyncpa [#allocation5], 0  ;;  %s3154_s0 = inlined_call_operand.hbm [shape: f32[16,32], index: 0, kind: input, shape index: {}]   ;;  %s3155_s1 = inlined_call_operand.hbm [shape: bf16[32,96], index: 1, kind: input, shape index: {}]   ;;  %s3156_s2 = inlined_call_operand.hbm [shape: bf16[32,32], index: 2, kind: input, shape index: {}]   ;;  %s3157_s3 = inlined_call_operand.vmem [shape: f32[1,32], index: 3, kind: input, shape index: {}]   ;;  %s3158_s4 = inlined_call_operand.hbm [shape: f32[16,32], index: 4, kind: output, shape index: {}]  }
   0x1   :  { %10 = vsyncpa [#allocation8], 0 }
   0x2   :  { %11 = vsyncpa [#allocation6], 0  ;;  %s2619_s15 = smov [#allocation7]   ;;  %s2525_s19 = scalar_lea.hbm %s3155_s1, 256 }
   0x3   :  { %s29_s16 = sshll.u32 %s2619_s15, 4  ;;  %p2526_p0 = scmp.ne.s32.totalorder %s3155_s1, %s2525_s19  ;;  %s30_s16 = int_to_ptr.vmem [resolvable:$true] %s29_s16 }
   0x4   :  { %p2529_p1 = scmp.lt.u32.totalorder %s2525_s19, %s3155_s1 }
   0x6   :  { %p2531_p2 = pnand %p2529_p1, %p2526_p0 }
   0x8   :  { %2534 = shalt.err (!%p2531_p2)
}
   0x9   :  { %s2535_s24 = scalar_lea.vmem %s30_s16, 256  ;;  %p2540_p4 = scmp.lt.s32.totalorder %s30_s16, %s30_s16 }
   0xa   :  { %p2536_p3 = scmp.ne.s32.totalorder %s30_s16, %s2535_s24  ;;  %p2541_p5 = scmp.lt.s32.totalorder %s2535_s24, %s2535_s24 }
   0xc   :  { %p2542_p6 = por %p2541_p5, %p2540_p4 }
   0xe   :  { %p2543_p7 = pnand %p2542_p6, %p2536_p3 }
  0x10   :  { %2546 = shalt.err (!%p2543_p7)
}
  0x11   :  { %s2620_s25 = smov 64   ;;  %s2621_s26 = smov 4  }
  0x12   :  { %35 = dma.hbm_to_vmem [thread:$0]  %s3155_s1, 256, %s30_s16, [#allocation8], %s2620_s25, %s2620_s25, %s2621_s26  }
  0x13   :  { %s2622_s29 = smov [#allocation4]   ;;  %s2547_s7 = scalar_lea.hbm %s3154_s0, 256 }
  0x14   :  { %s17_s30 = sshll.u32 %s2622_s29, 4  ;;  %p2548_p8 = scmp.ne.s32.totalorder %s3154_s0, %s2547_s7  ;;  %s18_s30 = int_to_ptr.vmem [resolvable:$true] %s17_s30 }
  0x15   :  { %p2551_p9 = scmp.lt.u32.totalorder %s2547_s7, %s3154_s0 }
  0x17   :  { %p2553_p10 = pnand %p2551_p9, %p2548_p8 }
  0x19   :  { %2556 = shalt.err (!%p2553_p10)
}
  0x1a   :  { %s2557_s12 = scalar_lea.vmem %s18_s30, 256  ;;  %p2562_p12 = scmp.lt.s32.totalorder %s18_s30, %s18_s30 }
  0x1b   :  { %p2558_p11 = scmp.ne.s32.totalorder %s18_s30, %s2557_s12  ;;  %p2563_p13 = scmp.lt.s32.totalorder %s2557_s12, %s2557_s12 }
  0x1d   :  { %p2564_p0 = por %p2563_p13, %p2562_p12 }
  0x1f   :  { %p2565_p1 = pnand %p2564_p0, %p2558_p11 }
  0x21   :  { %2568 = shalt.err (!%p2565_p1)
}
  0x22   :  { %s2623_s1 = smov 128   ;;  %s2624_s13 = smov 8  }
  0x23   :  { %23 = dma.hbm_to_vmem [thread:$0]  %s3154_s0, 256, %s18_s30, [#allocation5], %s2623_s1, %s2623_s1, %s2624_s13  }
  0x24   :  { %s2625_s16 = smov [#allocation9]   ;;  %s2569_s20 = scalar_lea.hbm %s3156_s2, 256 }
  0x25   :  { %s41_s17 = sshll.u32 %s2625_s16, 4  ;;  %p2570_p2 = scmp.ne.s32.totalorder %s3156_s2, %s2569_s20  ;;  %s42_s17 = int_to_ptr.vmem [resolvable:$true] %s41_s17 }
  0x26   :  { %p2573_p3 = scmp.lt.u32.totalorder %s2569_s20, %s3156_s2 }
  0x28   :  { %p2575_p4 = pnand %p2573_p3, %p2570_p2 }
  0x2a   :  { %2578 = shalt.err (!%p2575_p4)
}
  0x2b   :  { %s2579_s27 = scalar_lea.vmem %s42_s17, 256  ;;  %p2584_p6 = scmp.lt.s32.totalorder %s42_s17, %s42_s17 }
  0x2c   :  { %p2580_p5 = scmp.ne.s32.totalorder %s42_s17, %s2579_s27  ;;  %p2585_p7 = scmp.lt.s32.totalorder %s2579_s27, %s2579_s27 }
  0x2e   :  { %p2586_p8 = por %p2585_p7, %p2584_p6 }
  0x30   :  { %p2587_p9 = pnand %p2586_p8, %p2580_p5 }
  0x32   :  { %2590 = shalt.err (!%p2587_p9)
}
  0x33   :  { %47 = dma.hbm_to_vmem [thread:$0]  %s3156_s2, 256, %s42_s17, [#allocation8], %s2620_s25, %s2620_s25, %s2621_s26  }
  0x34   :  { %2613 = dma.done.wait [#allocation5], 256  }
  0x35   :  { %2614 = vsyncadd [#allocation5], 4294967040 }
  0x36   :  { %2615 = dma.done.wait [#allocation8], 512  }
  0x37   :  { %2616 = vsyncadd [#allocation8], 4294966784  ;;  %v2626_v0 = vmov 0.0   ;;  %vm2627_vm0 = vmmov 0   ;;  %v2457_v1 = vld [vmem:[#allocation7] sm:$0xff]   ;;  %v2458_v2 = vld [vmem:[#allocation7 + $0x8] sm:$0xff]  }
  0x38   :  { %2212 = vmatprep.subr.bf16.mxu0 %v2626_v0  ;;  %2216 = vmatprep.mubr.msk.bf16.mxu0 %vm2627_vm0, %v2626_v0  ;;  %v60_v3 = vld [vmem:[#allocation4] sm:$0xff]  ;;  %v61_v4 = vld [vmem:[#allocation4 + $0x8] sm:$0xff]  ;;  %vm79_vm1 = vcmask 261120   ;;  %vm124_vm2 = vcmask 785408   ;;  %s2628_s2 = smov 92   ;;  %s2629_s29 = smov 96  }
  0x39   :  { %2220 = vmatprep.subr.bf16.mxu1 %v2626_v0  ;;  %2222 = vmatprep.mubr.msk.bf16.mxu1 %vm2627_vm0, %v2626_v0  ;;  %v62_v5 = vpack.c.bf16 %v61_v4, %v60_v3  ;;  %s2630_s30 = smov 124   ;;  %s2631_s5 = smov 120   ;;  %vm132_vm3 = vcmask 31744   ;;  %vm197_vm4 = vcmask 1043456   ;;  %vm179_vm5 = vcmask 64512  }
  0x3a   :  { %2213 = vmatpush3.bf16.msra.mxu0 %v2457_v1  ;;  %s2632_s6 = smov 88   ;;  %s2633_s7 = smov 116   ;;  %vm471_vm6 = vcmask 64544   ;;  %vm708_vm7 = vcmask 97344   ;;  %vm945_vm8 = vcmask 130144   ;;  %vm1182_vm9 = vcmask 162944  }
  0x3b   :  { %2214 = vmatprep.subr.bf16.mxu0 %v2626_v0  ;;  %s2634_s8 = smov 84   ;;  %s2635_s9 = smov 112   ;;  %vm1419_vm10 = vcmask 195744   ;;  %vm1656_vm11 = vcmask 228544   ;;  %vm1893_vm12 = vcmask 261344  }
  0x3c   :  { %s2636_s10 = smov 80   ;;  %s2637_s11 = smov 108  }
  0x3d   :  { %s2638_s12 = smov 76   ;;  %s2639_s14 = smov 104  }
  0x3e   :  { %2215 = vmatpush3.bf16.msra.mxu0 %v2458_v2  ;;  %s2640_s15 = smov 72   ;;  %s2641_s16 = smov 100  }
  0x3f   :  { %2226 = vmatprep.subr.bf16.mxu0 %v2626_v0  ;;  %s2642_s17 = smov 68   ;;  %s2643_s18 = smov 60  }
  0x40   :  { %s2645_s19 = smov 52   ;;  %s2646_s20 = smov 48  }
  0x41   :  { %2217 = vmatmul.mubr.msk.bf16.vlgmr.msra.gmra.mrb[0].mxu0 %vm79_vm1, %v62_v5  ;;  %s2647_s21 = smov 44   ;;  %s2648_s22 = smov 40  }
  0x42   :  { %2228 = vmatprep.mubr.msk.bf16.mxu0 %vm2627_vm0, %v2626_v0  ;;  %s2649_s23 = smov 36   ;;  %s2650_s24 = smov 12  }
  0x43   :  { %s2652_s27 = smov 20   ;;  %s2653_s0 = smov 24  }
  0x44   :  { %s2654_s28 = smov 28  }
 0x114   :  { %v117_v6 = vpop.f32.mrb[0].mxu0 }
 0x115   :  { %125 = vst.msk [vmem:[#allocation2] sm:$0xff] %vm124_vm2, %v117_v6  ;;  %v2218_v7 = vpop.f32.mrb[1].mxu0 }
 0x116   :  { %v120_v8 = vpop.f32.mrb[2].mxu0 }
 0x117   :  { %126 = vst.msk [vmem:[#allocation2 + $0x8] sm:$0xff] %vm124_vm2, %v120_v8  ;;  %v2219_v9 = vpop.f32.mrb[3].mxu0 }
 0x11c   :  { %v354_v10 = vld [vmem:[#allocation2] sm:$0xff] }
 0x11d   :  { %v2737_v11 = vpack.c.bf16 %v354_v10, %v354_v10 }
 0x11e   :  { %v242_v12 = vld [vmem:[#allocation2 + $0x8] sm:$0xff] }
 0x11f   :  { %359 = vrot.lane.b32.xlu1 %v2737_v11, %s2628_s2  ;;  %130 = vrot.lane.b32.xlu0 %v2737_v11, %s2629_s29  ;;  %v2741_v13 = vpack.c.bf16 %v242_v12, %v242_v12 }
 0x123   :  { %357 = vrot.lane.b32.xlu1 %v2737_v11, %s2630_s30  ;;  %245 = vrot.lane.b32.xlu0 %v2741_v13, %s2629_s29 }
 0x127   :  { %476 = vrot.lane.b32.xlu1 %v2741_v13, %s2630_s30  ;;  %478 = vrot.lane.b32.xlu0 %v2741_v13, %s2628_s2  ;;  %s2655_s30 = smov [#allocation10]  }
 0x12b   :  { %594 = vrot.lane.b32.xlu1 %v2737_v11, %s2631_s5  ;;  %596 = vrot.lane.b32.xlu0 %v2737_v11, %s2632_s6 }
 0x12f   :  { %713 = vrot.lane.b32.xlu1 %v2741_v13, %s2631_s5  ;;  %715 = vrot.lane.b32.xlu0 %v2741_v13, %s2632_s6  ;;  %s2090_s5 = sshll.u32 %s2655_s30, 4  ;;  %s2091_s5 = int_to_ptr.vmem [resolvable:$true] %s2090_s5 }
 0x130   :  { %s2591_s6 = scalar_lea.vmem %s2091_s5, 256  ;;  %p2596_p11 = scmp.lt.s32.totalorder %s2091_s5, %s2091_s5 }
 0x131   :  { %p2592_p10 = scmp.ne.s32.totalorder %s2091_s5, %s2591_s6  ;;  %p2597_p12 = scmp.lt.s32.totalorder %s2591_s6, %s2591_s6 }
 0x133   :  { %831 = vrot.lane.b32.xlu1 %v2737_v11, %s2633_s7  ;;  %833 = vrot.lane.b32.xlu0 %v2737_v11, %s2634_s8  ;;  %p2598_p13 = por %p2597_p12, %p2596_p11 }
 0x135   :  { %p2599_p0 = pnand %p2598_p13, %p2592_p10 }
 0x137   :  { %950 = vrot.lane.b32.xlu1 %v2741_v13, %s2633_s7  ;;  %952 = vrot.lane.b32.xlu0 %v2741_v13, %s2634_s8 }
 0x13b   :  { %1068 = vrot.lane.b32.xlu1 %v2737_v11, %s2635_s9  ;;  %1070 = vrot.lane.b32.xlu0 %v2737_v11, %s2636_s10 }
 0x13f   :  { %1187 = vrot.lane.b32.xlu1 %v2741_v13, %s2635_s9  ;;  %1189 = vrot.lane.b32.xlu0 %v2741_v13, %s2636_s10 }
 0x143   :  { %1305 = vrot.lane.b32.xlu1 %v2737_v11, %s2637_s11  ;;  %1307 = vrot.lane.b32.xlu0 %v2737_v11, %s2638_s12 }
 0x147   :  { %1424 = vrot.lane.b32.xlu1 %v2741_v13, %s2637_s11  ;;  %1426 = vrot.lane.b32.xlu0 %v2741_v13, %s2638_s12 }
 0x14b   :  { %1542 = vrot.lane.b32.xlu1 %v2737_v11, %s2639_s14  ;;  %1544 = vrot.lane.b32.xlu0 %v2737_v11, %s2640_s15 }
 0x14f   :  { %1661 = vrot.lane.b32.xlu1 %v2741_v13, %s2639_s14  ;;  %1663 = vrot.lane.b32.xlu0 %v2741_v13, %s2640_s15 }
 0x153   :  { %1779 = vrot.lane.b32.xlu1 %v2737_v11, %s2641_s16  ;;  %1781 = vrot.lane.b32.xlu0 %v2737_v11, %s2642_s17 }
 0x157   :  { %1898 = vrot.lane.b32.xlu1 %v2741_v13, %s2641_s16  ;;  %1900 = vrot.lane.b32.xlu0 %v2741_v13, %s2642_s17 }
 0x15b   :  { %419 = vrot.lane.b32.xlu1 %v2737_v11, %s2643_s18  ;;  %192 = vrot.lane.b32.xlu0 %v2737_v11, %s2620_s25 }
 0x15f   :  { %305 = vrot.lane.b32.xlu1 %v2741_v13, %s2620_s25  ;;  %s2644_s25 = smov 56  }
 0x191   :  { %v131_v14 = vpop.permute.xlu0 %130  ;;  %v360_v20 = vpop.permute.xlu1 %359 }
 0x192   :  { %v137_v15 = vsel %vm132_vm3, %v131_v14, 0  ;;  %v365_v22 = vsel %vm132_vm3, %v360_v20, 0 }
 0x193   :  { %2221 = vmatpush3.bf16.xpose.msra.mxu1 %v137_v15 }
 0x194   :  { %2232 = vmatprep.subr.bf16.mxu1 %v2626_v0 }
 0x195   :  { %v246_v16 = vpop.permute.xlu0 %245  ;;  %v358_v24 = vpop.permute.xlu1 %357 }
 0x196   :  { %v251_v18 = vsel %vm132_vm3, %v246_v16, 0 }
 0x199   :  { %v479_v17 = vpop.permute.xlu0 %478  ;;  %v477_v28 = vpop.permute.xlu1 %476 }
 0x19a   :  { %2223 = vmatmul.mubr.msk.bf16.vlgmr.msra.gmra.mrb[0].mxu1 %vm132_vm3, %v2737_v11  ;;  %v484_v26 = vsel %vm132_vm3, %v479_v17, 0 }
 0x19b   :  { %2233 = vmatpush3.bf16.xpose.msra.mxu1 %v251_v18  ;;  %2234 = vmatprep.mubr.msk.bf16.mxu1 %vm2627_vm0, %v2626_v0 }
 0x19c   :  { %2244 = vmatprep.subr.bf16.mxu1 %v2626_v0 }
 0x19d   :  { %v597_v19 = vpop.permute.xlu0 %596  ;;  %v595_v32 = vpop.permute.xlu1 %594 }
 0x19e   :  { %v602_v30 = vsel %vm132_vm3, %v597_v19, 0 }
 0x1a1   :  { %v716_v21 = vpop.permute.xlu0 %715  ;;  %v714_v36 = vpop.permute.xlu1 %713 }
 0x1a2   :  { %2235 = vmatmul.mubr.msk.bf16.vlgmr.msra.gmra.mrb[4].mxu1 %vm132_vm3, %v2741_v13  ;;  %v721_v34 = vsel %vm132_vm3, %v716_v21, 0 }
 0x1a3   :  { %2245 = vmatpush3.bf16.xpose.msra.mxu1 %v365_v22  ;;  %2246 = vmatprep.mubr.msk.bf16.mxu1 %vm2627_vm0, %v2626_v0 }
 0x1a4   :  { %2256 = vmatprep.subr.bf16.mxu1 %v2626_v0 }
 0x1a5   :  { %v834_v23 = vpop.permute.xlu0 %833  ;;  %v832_v40 = vpop.permute.xlu1 %831 }
 0x1a6   :  { %v839_v38 = vsel %vm132_vm3, %v834_v23, 0 }
 0x1a9   :  { %v953_v25 = vpop.permute.xlu0 %952  ;;  %v951_v45 = vpop.permute.xlu1 %950 }
 0x1aa   :  { %2247 = vmatmul.mubr.msk.bf16.vlgmr.msra.gmra.mrb[8].mxu1 %vm132_vm3, %v358_v24  ;;  %v958_v42 = vsel %vm132_vm3, %v953_v25, 0 }
 0x1ab   :  { %2257 = vmatpush3.bf16.xpose.msra.mxu1 %v484_v26  ;;  %2258 = vmatprep.mubr.msk.bf16.mxu1 %vm2627_vm0, %v2626_v0 }
 0x1ac   :  { %2268 = vmatprep.subr.bf16.mxu1 %v2626_v0 }
 0x1ad   :  { %v1071_v27 = vpop.permute.xlu0 %1070  ;;  %v1069_v47 = vpop.permute.xlu1 %1068 }
 0x1ae   :  { %v1076_v46 = vsel %vm132_vm3, %v1071_v27, 0 }
 0x1b1   :  { %v1190_v29 = vpop.permute.xlu0 %1189  ;;  %v1188_v49 = vpop.permute.xlu1 %1187 }
 0x1b2   :  { %2259 = vmatmul.mubr.msk.bf16.vlgmr.msra.gmra.mrb[12].mxu1 %vm132_vm3, %v477_v28  ;;  %v1195_v48 = vsel %vm132_vm3, %v1190_v29, 0 }
 0x1b3   :  { %2269 = vmatpush3.bf16.xpose.msra.mxu1 %v602_v30  ;;  %2270 = vmatprep.mubr.msk.bf16.mxu1 %vm2627_vm0, %v2626_v0 }
 0x1b4   :  { %2280 = vmatprep.subr.bf16.mxu1 %v2626_v0 }
 0x1b5   :  { %v1308_v31 = vpop.permute.xlu0 %1307  ;;  %v1306_v51 = vpop.permute.xlu1 %1305 }
 0x1b6   :  { %v1313_v50 = vsel %vm132_vm3, %v1308_v31, 0 }
 0x1b9   :  { %v1427_v33 = vpop.permute.xlu0 %1426  ;;  %v1425_v53 = vpop.permute.xlu1 %1424 }
 0x1ba   :  { %2271 = vmatmul.mubr.msk.bf16.vlgmr.msra.gmra.mrb[16].mxu1 %vm132_vm3, %v595_v32  ;;  %v1432_v52 = vsel %vm132_vm3, %v1427_v33, 0 }
 0x1bb   :  { %2281 = vmatpush3.bf16.xpose.msra.mxu1 %v721_v34  ;;  %2282 = vmatprep.mubr.msk.bf16.mxu1 %vm2627_vm0, %v2626_v0 }
 0x1bc   :  { %2292 = vmatprep.subr.bf16.mxu1 %v2626_v0 }
 0x1bd   :  { %v1545_v35 = vpop.permute.xlu0 %1544  ;;  %v1543_v55 = vpop.permute.xlu1 %1542 }
 0x1be   :  { %v1550_v54 = vsel %vm132_vm3, %v1545_v35, 0 }
 0x1c1   :  { %v1664_v37 = vpop.permute.xlu0 %1663  ;;  %v1662_v57 = vpop.permute.xlu1 %1661 }
 0x1c2   :  { %2283 = vmatmul.mubr.msk.bf16.vlgmr.msra.gmra.mrb[20].mxu1 %vm132_vm3, %v714_v36  ;;  %v1669_v56 = vsel %vm132_vm3, %v1664_v37, 0 }
 0x1c3   :  { %2293 = vmatpush3.bf16.xpose.msra.mxu1 %v839_v38  ;;  %2294 = vmatprep.mubr.msk.bf16.mxu1 %vm2627_vm0, %v2626_v0 }
 0x1c4   :  { %2304 = vmatprep.subr.bf16.mxu1 %v2626_v0 }
 0x1c5   :  { %v1782_v39 = vpop.permute.xlu0 %1781  ;;  %v1780_v59 = vpop.permute.xlu1 %1779 }
 0x1c6   :  { %v1787_v58 = vsel %vm132_vm3, %v1782_v39, 0 }
 0x1c9   :  { %v1901_v41 = vpop.permute.xlu0 %1900  ;;  %v1899_v61 = vpop.permute.xlu1 %1898 }
 0x1ca   :  { %2295 = vmatmul.mubr.msk.bf16.vlgmr.msra.gmra.mrb[24].mxu1 %vm132_vm3, %v832_v40  ;;  %v1906_v60 = vsel %vm132_vm3, %v1901_v41, 0 }
 0x1cb   :  { %2305 = vmatpush3.bf16.xpose.msra.mxu1 %v958_v42  ;;  %2306 = vmatprep.mubr.msk.bf16.mxu1 %vm2627_vm0, %v2626_v0 }
 0x1cc   :  { %2316 = vmatprep.subr.bf16.mxu1 %v2626_v0 }
 0x1cd   :  { %v193_v43 = vpop.permute.xlu0 %192 }
 0x1ce   :  { %v199_v44 = vsel %vm197_vm4, %v193_v43, 0 }
 0x1cf   :  { %2227 = vmatpush3.bf16.msra.mxu0 %v199_v44 }
 0x1d0   :  { %2238 = vmatprep.subr.bf16.mxu0 %v2626_v0 }
 0x1d2   :  { %2307 = vmatmul.mubr.msk.bf16.vlgmr.msra.gmra.mrb[28].mxu1 %vm132_vm3, %v951_v45 }
 0x1d3   :  { %2317 = vmatpush3.bf16.xpose.msra.mxu1 %v1076_v46  ;;  %2318 = vmatprep.mubr.msk.bf16.mxu1 %vm2627_vm0, %v2626_v0 }
 0x1d4   :  { %2328 = vmatprep.subr.bf16.mxu1 %v2626_v0 }
 0x1da   :  { %2319 = vmatmul.mubr.msk.bf16.vlgmr.msra.gmra.mrb[32].mxu1 %vm132_vm3, %v1069_v47 }
 0x1db   :  { %2329 = vmatpush3.bf16.xpose.msra.mxu1 %v1195_v48  ;;  %2330 = vmatprep.mubr.msk.bf16.mxu1 %vm2627_vm0, %v2626_v0 }
 0x1dc   :  { %2340 = vmatprep.subr.bf16.mxu1 %v2626_v0 }
 0x1e2   :  { %2331 = vmatmul.mubr.msk.bf16.vlgmr.msra.gmra.mrb[36].mxu1 %vm132_vm3, %v1188_v49 }
 0x1e3   :  { %2341 = vmatpush3.bf16.xpose.msra.mxu1 %v1313_v50  ;;  %2342 = vmatprep.mubr.msk.bf16.mxu1 %vm2627_vm0, %v2626_v0 }
 0x1e4   :  { %2352 = vmatprep.subr.bf16.mxu1 %v2626_v0 }
 0x1ea   :  { %2343 = vmatmul.mubr.msk.bf16.vlgmr.msra.gmra.mrb[40].mxu1 %vm132_vm3, %v1306_v51 }
 0x1eb   :  { %2353 = vmatpush3.bf16.xpose.msra.mxu1 %v1432_v52  ;;  %2354 = vmatprep.mubr.msk.bf16.mxu1 %vm2627_vm0, %v2626_v0 }
 0x1ec   :  { %2364 = vmatprep.subr.bf16.mxu1 %v2626_v0 }
 0x1f2   :  { %2355 = vmatmul.mubr.msk.bf16.vlgmr.msra.gmra.mrb[44].mxu1 %vm132_vm3, %v1425_v53 }
 0x1f3   :  { %2365 = vmatpush3.bf16.xpose.msra.mxu1 %v1550_v54  ;;  %2366 = vmatprep.mubr.msk.bf16.mxu1 %vm2627_vm0, %v2626_v0 }
 0x1f4   :  { %2376 = vmatprep.subr.bf16.mxu1 %v2626_v0 }
 0x1fa   :  { %2367 = vmatmul.mubr.msk.bf16.vlgmr.msra.gmra.mrb[48].mxu1 %vm132_vm3, %v1543_v55 }
 0x1fb   :  { %2377 = vmatpush3.bf16.xpose.msra.mxu1 %v1669_v56  ;;  %2378 = vmatprep.mubr.msk.bf16.mxu1 %vm2627_vm0, %v2626_v0 }
 0x1fc   :  { %2388 = vmatprep.subr.bf16.mxu1 %v2626_v0 }
 0x202   :  { %2379 = vmatmul.mubr.msk.bf16.vlgmr.msra.gmra.mrb[52].mxu1 %vm132_vm3, %v1662_v57 }
 0x203   :  { %2389 = vmatpush3.bf16.xpose.msra.mxu1 %v1787_v58  ;;  %2390 = vmatprep.mubr.msk.bf16.mxu1 %vm2627_vm0, %v2626_v0 }
 0x204   :  { %2400 = vmatprep.subr.bf16.mxu1 %v2626_v0 }
 0x20a   :  { %2391 = vmatmul.mubr.msk.bf16.vlgmr.msra.gmra.mrb[56].mxu1 %vm132_vm3, %v1780_v59 }
 0x20b   :  { %2401 = vmatpush3.bf16.xpose.msra.mxu1 %v1906_v60  ;;  %2402 = vmatprep.mubr.msk.bf16.mxu1 %vm2627_vm0, %v2626_v0 }
 0x20c   :  { %2412 = vmatprep.subr.bf16.mxu1 %v2626_v0 }
 0x212   :  { %2403 = vmatmul.mubr.msk.bf16.vlgmr.msra.gmra.mrb[60].mxu1 %vm132_vm3, %v1899_v61 }
 0x213   :  { %2416 = vmatprep.mubr.msk.bf16.mxu1 %vm2627_vm0, %v2626_v0 }
 0x26d   :  { %v2861_v62 = vpop.f32.mrb[0].mxu1 }
 0x26e   :  { %v2224_v63 = vpop.f32.mrb[1].mxu1  ;;  %v180_v1 = vsel %vm179_vm5, %v2861_v62, -inf }
 0x26f   :  { %v176_v2 = vpop.f32.mrb[2].mxu1  ;;  %181 = vmax.xlane.f32.xlu0 %v180_v1 }
 0x270   :  { %v2225_v3 = vpop.f32.mrb[3].mxu1 }
 0x275   :  { %v2865_v4 = vpop.f32.mrb[4].mxu1 }
 0x276   :  { %v2236_v5 = vpop.f32.mrb[5].mxu1  ;;  %v293_v6 = vsel %vm179_vm5, %v2865_v4, -inf }
 0x277   :  { %294 = vmax.xlane.f32.xlu1 %v293_v6  ;;  %v290_v7 = vpop.f32.mrb[6].mxu1 }
 0x278   :  { %v2237_v8 = vpop.f32.mrb[7].mxu1 }
 0x27d   :  { %v2869_v9 = vpop.f32.mrb[8].mxu1 }
 0x27e   :  { %v2248_v10 = vpop.f32.mrb[9].mxu1  ;;  %v407_v12 = vsel %vm179_vm5, %v2869_v9, -inf }
 0x27f   :  { %408 = vmax.xlane.f32.xlu0 %v407_v12  ;;  %v404_v14 = vpop.f32.mrb[10].mxu1 }
 0x280   :  { %v2249_v15 = vpop.f32.mrb[11].mxu1 }
 0x285   :  { %v2873_v16 = vpop.f32.mrb[12].mxu1 }
 0x286   :  { %v2260_v17 = vpop.f32.mrb[13].mxu1  ;;  %v526_v18 = vsel %vm179_vm5, %v2873_v16, -inf }
 0x287   :  { %527 = vmax.xlane.f32.xlu0 %v526_v18  ;;  %v523_v19 = vpop.f32.mrb[14].mxu1 }
 0x288   :  { %v2261_v20 = vpop.f32.mrb[15].mxu1 }
 0x28d   :  { %v2877_v21 = vpop.f32.mrb[16].mxu1 }
 0x28e   :  { %v2272_v22 = vpop.f32.mrb[17].mxu1  ;;  %v644_v23 = vsel %vm179_vm5, %v2877_v21, -inf }
 0x28f   :  { %645 = vmax.xlane.f32.xlu1 %v644_v23  ;;  %v641_v24 = vpop.f32.mrb[18].mxu1 }
 0x290   :  { %v2273_v25 = vpop.f32.mrb[19].mxu1 }
 0x291   :  { %v2929_v25 = vpop.permute.xlu1 %419 }
 0x295   :  { %v2881_v26 = vpop.f32.mrb[20].mxu1 }
 0x296   :  { %v2284_v27 = vpop.f32.mrb[21].mxu1  ;;  %v763_v28 = vsel %vm179_vm5, %v2881_v26, -inf }
 0x297   :  { %764 = vmax.xlane.f32.xlu0 %v763_v28  ;;  %v760_v29 = vpop.f32.mrb[22].mxu1 }
 0x298   :  { %v2285_v30 = vpop.f32.mrb[23].mxu1 }
 0x299   :  { %v2932_v30 = vpop.permute.xlu1 %305 }
 0x29d   :  { %v2885_v31 = vpop.f32.mrb[24].mxu1 }
 0x29e   :  { %v2296_v32 = vpop.f32.mrb[25].mxu1  ;;  %v881_v33 = vsel %vm179_vm5, %v2885_v31, -inf }
 0x29f   :  { %882 = vmax.xlane.f32.xlu1 %v881_v33  ;;  %v878_v34 = vpop.f32.mrb[26].mxu1 }
 0x2a0   :  { %v2297_v35 = vpop.f32.mrb[27].mxu1 }
 0x2a5   :  { %v2889_v36 = vpop.f32.mrb[28].mxu1 }
 0x2a6   :  { %v2308_v37 = vpop.f32.mrb[29].mxu1  ;;  %v1000_v38 = vsel %vm179_vm5, %v2889_v36, -inf }
 0x2a7   :  { %1001 = vmax.xlane.f32.xlu0 %v1000_v38  ;;  %v997_v39 = vpop.f32.mrb[30].mxu1 }
 0x2a8   :  { %v2309_v40 = vpop.f32.mrb[31].mxu1 }
 0x2ad   :  { %v2893_v41 = vpop.f32.mrb[32].mxu1 }
 0x2ae   :  { %v2320_v42 = vpop.f32.mrb[33].mxu1  ;;  %v1118_v43 = vsel %vm179_vm5, %v2893_v41, -inf }
 0x2af   :  { %1119 = vmax.xlane.f32.xlu1 %v1118_v43  ;;  %v1115_v44 = vpop.f32.mrb[34].mxu1 }
 0x2b0   :  { %v2321_v45 = vpop.f32.mrb[35].mxu1 }
 0x2b5   :  { %v2897_v46 = vpop.f32.mrb[36].mxu1 }
 0x2b6   :  { %v2332_v47 = vpop.f32.mrb[37].mxu1  ;;  %v1237_v5 = vsel %vm179_vm5, %v2897_v46, -inf }
 0x2b7   :  { %v1234_v48 = vpop.f32.mrb[38].mxu1 }
 0x2b8   :  { %v2333_v49 = vpop.f32.mrb[39].mxu1 }
 0x2bd   :  { %538 = vrot.lane.b32.xlu0 %v2741_v13, %s2643_s18  ;;  %v2901_v50 = vpop.f32.mrb[40].mxu1 }
 0x2be   :  { %v2344_v51 = vpop.f32.mrb[41].mxu1  ;;  %v1355_v12 = vsel %vm179_vm5, %v2901_v50, -inf }
 0x2bf   :  { %v1352_v52 = vpop.f32.mrb[42].mxu1 }
 0x2c0   :  { %656 = vrot.lane.b32.xlu1 %v2737_v11, %s2644_s25  ;;  %v2345_v53 = vpop.f32.mrb[43].mxu1 }
 0x2c5   :  { %v2905_v54 = vpop.f32.mrb[44].mxu1 }
 0x2c6   :  { %v2356_v55 = vpop.f32.mrb[45].mxu1  ;;  %v1474_v18 = vsel %vm179_vm5, %v2905_v54, -inf }
 0x2c7   :  { %v1471_v56 = vpop.f32.mrb[46].mxu1 }
 0x2c8   :  { %v2357_v57 = vpop.f32.mrb[47].mxu1 }
 0x2cd   :  { %v2907_v58 = vpop.f32.mrb[48].mxu1 }
 0x2ce   :  { %v2368_v59 = vpop.f32.mrb[49].mxu1  ;;  %v1592_v20 = vsel %vm179_vm5, %v2907_v58, -inf }
 0x2cf   :  { %v1589_v60 = vpop.f32.mrb[50].mxu1 }
 0x2d0   :  { %v2369_v61 = vpop.f32.mrb[51].mxu1 }
 0x2d5   :  { %v2909_v63 = vpop.f32.mrb[52].mxu1 }
 0x2d6   :  { %v2380_v1 = vpop.f32.mrb[53].mxu1  ;;  %v1711_v22 = vsel %vm179_vm5, %v2909_v63, -inf }
 0x2d7   :  { %v1708_v2 = vpop.f32.mrb[54].mxu1 }
 0x2d8   :  { %v2381_v3 = vpop.f32.mrb[55].mxu1 }
 0x2dc   :  { %1238 = vmax.xlane.f32.xlu0 %v1237_v5 }
 0x2dd   :  { %v2913_v6 = vpop.f32.mrb[56].mxu1 }
 0x2de   :  { %v2392_v7 = vpop.f32.mrb[57].mxu1  ;;  %v1829_v23 = vsel %vm179_vm5, %v2913_v6, -inf }
 0x2df   :  { %v1826_v8 = vpop.f32.mrb[58].mxu1 }
 0x2e0   :  { %v2393_v10 = vpop.f32.mrb[59].mxu1 }
 0x2e4   :  { %1356 = vmax.xlane.f32.xlu1 %v1355_v12 }
 0x2e5   :  { %v2917_v14 = vpop.f32.mrb[60].mxu1 }
 0x2e6   :  { %v2404_v15 = vpop.f32.mrb[61].mxu1  ;;  %v1948_v24 = vsel %vm179_vm5, %v2917_v14, -inf }
 0x2e7   :  { %v1945_v17 = vpop.f32.mrb[62].mxu1 }
 0x2e8   :  { %1475 = vmax.xlane.f32.xlu1 %v1474_v18  ;;  %v2405_v19 = vpop.f32.mrb[63].mxu1 }
 0x2ec   :  { %1593 = vmax.xlane.f32.xlu1 %v1592_v20 }
 0x2f0   :  { %1712 = vmax.xlane.f32.xlu1 %v1711_v22 }
 0x2f4   :  { %1830 = vmax.xlane.f32.xlu1 %v1829_v23 }
 0x2f8   :  { %1949 = vmax.xlane.f32.xlu1 %v1948_v24 }
 0x2fc   :  { %v182_v27 = vpop.xlane.xlu0 %181 }
 0x2fd   :  { %v183_v28 = vsub.f32 %v2861_v62, %v182_v27 }
 0x2ff   :  { %v184_v29 = vmul.f32 1.442695, %v183_v28 }
 0x301   :  { %2461 = vpow2.f32 %v184_v29 }
 0x304   :  { %v295_v32 = vpop.xlane.xlu1 %294 }
 0x305   :  { %v296_v33 = vsub.f32 %v2865_v4, %v295_v32 }
 0x307   :  { %v297_v34 = vmul.f32 1.442695, %v296_v33 }
 0x309   :  { %2463 = vpow2.f32 %v297_v34 }
 0x30b   :  { %v2935_v35 = vpop.eup %2461 }
 0x30c   :  { %v409_v37 = vpop.xlane.xlu0 %408  ;;  %v186_v38 = vsel %vm179_vm5, %v2935_v35, 0.0 }
 0x30d   :  { %v410_v39 = vsub.f32 %v2869_v9, %v409_v37  ;;  %187 = vadd.xlane.f32.xlu0 %v186_v38 }
 0x30f   :  { %v411_v40 = vmul.f32 1.442695, %v410_v39 }
 0x311   :  { %2465 = vpow2.f32 %v411_v40 }
 0x313   :  { %v2940_v62 = vpop.eup %2463 }
 0x314   :  { %v528_v42 = vpop.xlane.xlu0 %527  ;;  %v299_v43 = vsel %vm179_vm5, %v2940_v62, 0.0 }
 0x315   :  { %v529_v4 = vsub.f32 %v2873_v16, %v528_v42  ;;  %300 = vadd.xlane.f32.xlu0 %v299_v43 }
 0x317   :  { %v530_v44 = vmul.f32 1.442695, %v529_v4 }
 0x319   :  { %2467 = vpow2.f32 %v530_v44 }
 0x31b   :  { %v2945_v45 = vpop.eup %2465 }
 0x31c   :  { %v646_v47 = vpop.xlane.xlu1 %645  ;;  %v413_v9 = vsel %vm179_vm5, %v2945_v45, 0.0 }
 0x31d   :  { %v647_v48 = vsub.f32 %v2877_v21, %v646_v47  ;;  %414 = vadd.xlane.f32.xlu0 %v413_v9 }
 0x31f   :  { %v648_v49 = vmul.f32 1.442695, %v647_v48 }
 0x321   :  { %2469 = vpow2.f32 %v648_v49 }
 0x323   :  { %v2950_v51 = vpop.eup %2467 }
 0x324   :  { %v765_v52 = vpop.xlane.xlu0 %764  ;;  %v532_v16 = vsel %vm179_vm5, %v2950_v51, 0.0 }
 0x325   :  { %v766_v53 = vsub.f32 %v2881_v26, %v765_v52  ;;  %533 = vadd.xlane.f32.xlu0 %v532_v16 }
 0x327   :  { %v767_v55 = vmul.f32 1.442695, %v766_v53 }
 0x329   :  { %2471 = vpow2.f32 %v767_v55 }
 0x32b   :  { %v2955_v56 = vpop.eup %2469 }
 0x32c   :  { %v883_v57 = vpop.xlane.xlu1 %882  ;;  %v650_v21 = vsel %vm179_vm5, %v2955_v56, 0.0 }
 0x32d   :  { %v884_v59 = vsub.f32 %v2885_v31, %v883_v57  ;;  %651 = vadd.xlane.f32.xlu1 %v650_v21 }
 0x32f   :  { %v885_v60 = vmul.f32 1.442695, %v884_v59 }
 0x331   :  { %2473 = vpow2.f32 %v885_v60 }
 0x333   :  { %v2960_v61 = vpop.eup %2471 }
 0x334   :  { %v1002_v1 = vpop.xlane.xlu0 %1001  ;;  %v769_v26 = vsel %vm179_vm5, %v2960_v61, 0.0 }
 0x335   :  { %v1003_v2 = vsub.f32 %v2889_v36, %v1002_v1  ;;  %770 = vadd.xlane.f32.xlu0 %v769_v26 }
 0x337   :  { %v1004_v3 = vmul.f32 1.442695, %v1003_v2  ;;  %v311_v2 = vsel %vm197_vm4, %v2932_v30, 0 }
 0x338   :  { %v2978_v15 = vpop.permute.xlu0 %538 }
 0x339   :  { %2475 = vpow2.f32 %v1004_v3 }
 0x33b   :  { %v2965_v5 = vpop.eup %2473 }
 0x33c   :  { %v887_v7 = vsel %vm179_vm5, %v2965_v5, 0.0  ;;  %v1120_v36 = vpop.xlane.xlu1 %1119 }
 0x33d   :  { %888 = vadd.xlane.f32.xlu1 %v887_v7  ;;  %v1121_v10 = vsub.f32 %v2893_v41, %v1120_v36 }
 0x33f   :  { %v1122_v12 = vmul.f32 1.442695, %v1121_v10 }
 0x340   :  { %v2983_v22 = vpop.permute.xlu1 %656 }
 0x341   :  { %2477 = vpow2.f32 %v1122_v12 }
 0x343   :  { %v2969_v31 = vpop.eup %2475 }
 0x344   :  { %v1006_v8 = vsel %vm179_vm5, %v2969_v31, 0.0 }
 0x345   :  { %1007 = vadd.xlane.f32.xlu1 %v1006_v8 }
 0x34b   :  { %893 = vrot.lane.b32.xlu0 %v2737_v11, %s2645_s19  ;;  %v2980_v18 = vpop.eup %2477 }
 0x34c   :  { %v1124_v23 = vsel %vm179_vm5, %v2980_v18, 0.0 }
 0x34f   :  { %1012 = vrot.lane.b32.xlu0 %v2741_v13, %s2645_s19 }
 0x356   :  { %775 = vrot.lane.b32.xlu1 %v2741_v13, %s2644_s25 }
 0x369   :  { %v1239_v17 = vpop.xlane.xlu0 %1238 }
 0x36a   :  { %v1240_v19 = vsub.f32 %v2897_v46, %v1239_v17 }
 0x36c   :  { %v1241_v20 = vmul.f32 1.442695, %v1240_v19 }
 0x36e   :  { %2479 = vpow2.f32 %v1241_v20  ;;  %1125 = vadd.xlane.f32.xlu0 %v1124_v23 }
 0x371   :  { %v1357_v24 = vpop.xlane.xlu1 %1356 }
 0x372   :  { %v1358_v41 = vsub.f32 %v2901_v50, %v1357_v24 }
 0x374   :  { %v1359_v27 = vmul.f32 1.442695, %v1358_v41 }
 0x375   :  { %v1476_v28 = vpop.xlane.xlu1 %1475 }
 0x376   :  { %2481 = vpow2.f32 %v1359_v27  ;;  %v1477_v29 = vsub.f32 %v2905_v54, %v1476_v28 }
 0x378   :  { %v2989_v32 = vpop.eup %2479  ;;  %v1478_v33 = vmul.f32 1.442695, %v1477_v29 }
 0x379   :  { %v1594_v46 = vpop.xlane.xlu1 %1593  ;;  %v1243_v34 = vsel %vm179_vm5, %v2989_v32, 0.0 }
 0x37a   :  { %2483 = vpow2.f32 %v1478_v33  ;;  %v1595_v37 = vsub.f32 %v2907_v58, %v1594_v46  ;;  %1244 = vadd.xlane.f32.xlu1 %v1243_v34 }
 0x37c   :  { %v1596_v38 = vmul.f32 1.442695, %v1595_v37 }
 0x37d   :  { %v1713_v39 = vpop.xlane.xlu1 %1712 }
 0x37e   :  { %2485 = vpow2.f32 %v1596_v38  ;;  %v1714_v50 = vsub.f32 %v2909_v63, %v1713_v39 }
 0x380   :  { %v2995_v40 = vpop.eup %2481  ;;  %v1715_v42 = vmul.f32 1.442695, %v1714_v50 }
 0x381   :  { %v1831_v54 = vpop.xlane.xlu1 %1830  ;;  %v1361_v43 = vsel %vm179_vm5, %v2995_v40, 0.0 }
 0x382   :  { %2487 = vpow2.f32 %v1715_v42  ;;  %v1832_v4 = vsub.f32 %v2913_v6, %v1831_v54  ;;  %1362 = vadd.xlane.f32.xlu1 %v1361_v43 }
 0x384   :  { %v3000_v44 = vpop.eup %2483  ;;  %v1833_v58 = vmul.f32 1.442695, %v1832_v4  ;;  %1130 = vrot.lane.b32.xlu0 %v2737_v11, %s2646_s20 }
 0x385   :  { %v1950_v47 = vpop.xlane.xlu1 %1949  ;;  %v1480_v63 = vsel %vm179_vm5, %v3000_v44, 0.0 }
 0x386   :  { %2489 = vpow2.f32 %v1833_v58  ;;  %v1951_v9 = vsub.f32 %v2917_v14, %v1950_v47  ;;  %1481 = vadd.xlane.f32.xlu1 %v1480_v63 }
 0x388   :  { %v3006_v48 = vpop.eup %2485  ;;  %v1952_v49 = vmul.f32 1.442695, %v1951_v9  ;;  %1249 = vrot.lane.b32.xlu0 %v2741_v13, %s2646_s20 }
 0x389   :  { %v1598_v6 = vsel %vm179_vm5, %v3006_v48, 0.0 }
 0x38a   :  { %2491 = vpow2.f32 %v1952_v49  ;;  %1599 = vadd.xlane.f32.xlu1 %v1598_v6 }
 0x38c   :  { %v3011_v52 = vpop.eup %2487  ;;  %1367 = vrot.lane.b32.xlu0 %v2737_v11, %s2647_s21 }
 0x38d   :  { %v1717_v16 = vsel %vm179_vm5, %v3011_v52, 0.0 }
 0x38e   :  { %1718 = vadd.xlane.f32.xlu1 %v1717_v16 }
 0x390   :  { %v3016_v14 = vpop.eup %2489  ;;  %1486 = vrot.lane.b32.xlu0 %v2741_v13, %s2647_s21 }
 0x391   :  { %v1835_v53 = vsel %vm179_vm5, %v3016_v14, 0.0 }
 0x392   :  { %1836 = vadd.xlane.f32.xlu1 %v1835_v53 }
 0x394   :  { %v3021_v55 = vpop.eup %2491  ;;  %1604 = vrot.lane.b32.xlu0 %v2737_v11, %s2648_s22 }
 0x395   :  { %v1954_v57 = vsel %vm179_vm5, %v3021_v55, 0.0 }
 0x396   :  { %1955 = vadd.xlane.f32.xlu1 %v1954_v57 }
 0x398   :  { %1841 = vrot.lane.b32.xlu0 %v2737_v11, %s2649_s23 }
 0x39a   :  { %v188_v21 = vpop.xlane.xlu0 %187 }
 0x39b   :  { %2493 = vrcp.f32 %v188_v21 }
 0x39c   :  { %1960 = vrot.lane.b32.xlu0 %v2741_v13, %s2649_s23 }
 0x3a2   :  { %v301_v59 = vpop.xlane.xlu0 %300 }
 0x3a3   :  { %2495 = vrcp.f32 %v301_v59 }
 0x3a5   :  { %v2494_v60 = vpop.eup %2493 }
 0x3a6   :  { %v190_v1 = vmul.f32 %v2494_v60, %v2935_v35 }
 0x3a7   :  { %1723 = vrot.lane.b32.xlu1 %v2741_v13, %s2648_s22  ;;  %v425_v13 = vsel %vm197_vm4, %v2929_v25, 0 }
 0x3a8   :  { %v191_v26 = vpack.c.bf16 %v190_v1, %v190_v1 }
 0x3aa   :  { %2229 = vmatmul.mubr.msk.bf16.vlgmr.msra.gmra.mrb[4].mxu0 %vm179_vm5, %v191_v26  ;;  %v415_v3 = vpop.xlane.xlu0 %414 }
 0x3ab   :  { %2239 = vmatpush3.bf16.msra.mxu0 %v311_v2  ;;  %2497 = vrcp.f32 %v415_v3  ;;  %2240 = vmatprep.mubr.msk.bf16.mxu0 %vm2627_vm0, %v2626_v0 }
 0x3ac   :  { %2250 = vmatprep.subr.bf16.mxu0 %v2626_v0 }
 0x3ad   :  { %v2496_v11 = vpop.eup %2495 }
 0x3ae   :  { %v303_v7 = vmul.f32 %v2496_v11, %v2940_v62  ;;  %v544_v62 = vsel %vm197_vm4, %v2978_v15, 0 }
 0x3b0   :  { %v304_v35 = vpack.c.bf16 %v303_v7, %v303_v7 }
 0x3b2   :  { %2241 = vmatmul.mubr.msk.bf16.vlgmr.msra.gmra.mrb[8].mxu0 %vm179_vm5, %v304_v35  ;;  %v534_v30 = vpop.xlane.xlu0 %533 }
 0x3b3   :  { %2251 = vmatpush3.bf16.msra.mxu0 %v425_v13  ;;  %2499 = vrcp.f32 %v534_v30  ;;  %2252 = vmatprep.mubr.msk.bf16.mxu0 %vm2627_vm0, %v2626_v0 }
 0x3b4   :  { %2262 = vmatprep.subr.bf16.mxu0 %v2626_v0 }
 0x3b5   :  { %v2498_v8 = vpop.eup %2497 }
 0x3b6   :  { %v417_v36 = vmul.f32 %v2498_v8, %v2945_v45  ;;  %v662_v45 = vsel %vm197_vm4, %v2983_v22, 0 }
 0x3b8   :  { %v418_v10 = vpack.c.bf16 %v417_v36, %v417_v36 }
 0x3ba   :  { %v652_v12 = vpop.xlane.xlu1 %651  ;;  %2253 = vmatmul.mubr.msk.bf16.vlgmr.msra.gmra.mrb[12].mxu0 %vm179_vm5, %v418_v10 }
 0x3bb   :  { %2501 = vrcp.f32 %v652_v12  ;;  %2263 = vmatpush3.bf16.msra.mxu0 %v544_v62  ;;  %2264 = vmatprep.mubr.msk.bf16.mxu0 %vm2627_vm0, %v2626_v0 }
 0x3bc   :  { %2274 = vmatprep.subr.bf16.mxu0 %v2626_v0 }
 0x3bd   :  { %v2500_v25 = vpop.eup %2499 }
 0x3be   :  { %v536_v17 = vmul.f32 %v2500_v25, %v2950_v51 }
 0x3c0   :  { %v537_v19 = vpack.c.bf16 %v536_v17, %v536_v17 }
 0x3c2   :  { %2265 = vmatmul.mubr.msk.bf16.vlgmr.msra.gmra.mrb[16].mxu0 %vm179_vm5, %v537_v19  ;;  %v771_v20 = vpop.xlane.xlu0 %770 }
 0x3c3   :  { %2275 = vmatpush3.bf16.msra.mxu0 %v662_v45  ;;  %2276 = vmatprep.mubr.msk.bf16.mxu0 %vm2627_vm0, %v2626_v0  ;;  %2503 = vrcp.f32 %v771_v20 }
 0x3c4   :  { %2286 = vmatprep.subr.bf16.mxu0 %v2626_v0 }
 0x3c5   :  { %v2502_v15 = vpop.eup %2501 }
 0x3c6   :  { %v654_v23 = vmul.f32 %v2502_v15, %v2955_v56  ;;  %v894_v33 = vpop.permute.xlu0 %893 }
 0x3c7   :  { %v899_v34 = vsel %vm197_vm4, %v894_v33, 0 }
 0x3c8   :  { %v655_v24 = vpack.c.bf16 %v654_v23, %v654_v23 }
 0x3ca   :  { %2277 = vmatmul.mubr.msk.bf16.vlgmr.msra.gmra.mrb[20].mxu0 %vm179_vm5, %v655_v24  ;;  %v889_v51 = vpop.xlane.xlu1 %888  ;;  %v1013_v37 = vpop.permute.xlu0 %1012 }
 0x3cb   :  { %2288 = vmatprep.mubr.msk.bf16.mxu0 %vm2627_vm0, %v2626_v0  ;;  %2505 = vrcp.f32 %v889_v51  ;;  %v1018_v50 = vsel %vm197_vm4, %v1013_v37, 0 }
 0x3cd   :  { %v2504_v22 = vpop.eup %2503 }
 0x3ce   :  { %v773_v27 = vmul.f32 %v2504_v22, %v2960_v61 }
 0x3d0   :  { %v774_v56 = vpack.c.bf16 %v773_v27, %v773_v27 }
 0x3d2   :  { %v1008_v41 = vpop.xlane.xlu1 %1007 }
 0x3d3   :  { %2507 = vrcp.f32 %v1008_v41 }
 0x3d5   :  { %v2506_v46 = vpop.eup %2505 }
 0x3d6   :  { %v776_v28 = vpop.permute.xlu1 %775  ;;  %v891_v61 = vmul.f32 %v2506_v46, %v2965_v5 }
 0x3d7   :  { %v781_v29 = vsel %vm197_vm4, %v776_v28, 0 }
 0x3d8   :  { %2287 = vmatpush3.bf16.msra.mxu0 %v781_v29  ;;  %v892_v38 = vpack.c.bf16 %v891_v61, %v891_v61 }
 0x3d9   :  { %2298 = vmatprep.subr.bf16.mxu0 %v2626_v0 }
 0x3db   :  { %2289 = vmatmul.mubr.msk.bf16.vlgmr.msra.gmra.mrb[24].mxu0 %vm179_vm5, %v774_v56 }
 0x3dc   :  { %2299 = vmatpush3.bf16.msra.mxu0 %v899_v34  ;;  %2300 = vmatprep.mubr.msk.bf16.mxu0 %vm2627_vm0, %v2626_v0 }
 0x3dd   :  { %2310 = vmatprep.subr.bf16.mxu0 %v2626_v0  ;;  %v2508_v39 = vpop.eup %2507 }
 0x3de   :  { %v1010_v42 = vmul.f32 %v2508_v39, %v2969_v31 }
 0x3e0   :  { %v1011_v54 = vpack.c.bf16 %v1010_v42, %v1010_v42 }
 0x3e3   :  { %2301 = vmatmul.mubr.msk.bf16.vlgmr.msra.gmra.mrb[28].mxu0 %vm179_vm5, %v892_v38 }
 0x3e4   :  { %2311 = vmatpush3.bf16.msra.mxu0 %v1018_v50  ;;  %2312 = vmatprep.mubr.msk.bf16.mxu0 %vm2627_vm0, %v2626_v0 }
 0x3e5   :  { %2322 = vmatprep.subr.bf16.mxu0 %v2626_v0 }
 0x3eb   :  { %2313 = vmatmul.mubr.msk.bf16.vlgmr.msra.gmra.mrb[32].mxu0 %vm179_vm5, %v1011_v54 }
 0x3ec   :  { %2324 = vmatprep.mubr.msk.bf16.mxu0 %vm2627_vm0, %v2626_v0 }
 0x3fb   :  { %v1126_v5 = vpop.xlane.xlu0 %1125 }
 0x3fc   :  { %2509 = vrcp.f32 %v1126_v5 }
 0x3ff   :  { %v1131_v43 = vpop.permute.xlu0 %1130 }
 0x400   :  { %v1136_v4 = vsel %vm197_vm4, %v1131_v43, 0 }
 0x401   :  { %2323 = vmatpush3.bf16.msra.mxu0 %v1136_v4 }
 0x402   :  { %2334 = vmatprep.subr.bf16.mxu0 %v2626_v0 }
 0x403   :  { %v1250_v63 = vpop.permute.xlu0 %1249 }
 0x404   :  { %v1255_v49 = vsel %vm197_vm4, %v1250_v63, 0 }
 0x406   :  { %v2510_v58 = vpop.eup %2509 }
 0x407   :  { %v1128_v47 = vmul.f32 %v2510_v58, %v2980_v18  ;;  %v1245_v31 = vpop.xlane.xlu1 %1244  ;;  %v1368_v57 = vpop.permute.xlu0 %1367 }
 0x408   :  { %2511 = vrcp.f32 %v1245_v31  ;;  %v1373_v59 = vsel %vm197_vm4, %v1368_v57, 0 }
 0x409   :  { %v1129_v9 = vpack.c.bf16 %v1128_v47, %v1128_v47 }
 0x40b   :  { %2325 = vmatmul.mubr.msk.bf16.vlgmr.msra.gmra.mrb[36].mxu0 %vm179_vm5, %v1129_v9 }
 0x40c   :  { %2335 = vmatpush3.bf16.msra.mxu0 %v1255_v49  ;;  %2336 = vmatprep.mubr.msk.bf16.mxu0 %vm2627_vm0, %v2626_v0 }
 0x40d   :  { %2346 = vmatprep.subr.bf16.mxu0 %v2626_v0 }
 0x40f   :  { %v1363_v6 = vpop.xlane.xlu1 %1362 }
 0x410   :  { %2513 = vrcp.f32 %v1363_v6 }
 0x412   :  { %v2512_v16 = vpop.eup %2511 }
 0x413   :  { %v1247_v53 = vmul.f32 %v2512_v16, %v2989_v32  ;;  %v1482_v18 = vpop.xlane.xlu1 %1481  ;;  %v1487_v32 = vpop.permute.xlu0 %1486 }
 0x414   :  { %2515 = vrcp.f32 %v1482_v18  ;;  %v1492_v7 = vsel %vm197_vm4, %v1487_v32, 0 }
 0x415   :  { %v1248_v21 = vpack.c.bf16 %v1247_v53, %v1247_v53 }
 0x417   :  { %v1600_v60 = vpop.xlane.xlu1 %1599  ;;  %2337 = vmatmul.mubr.msk.bf16.vlgmr.msra.gmra.mrb[40].mxu0 %vm179_vm5, %v1248_v21  ;;  %v1605_v30 = vpop.permute.xlu0 %1604 }
 0x418   :  { %2347 = vmatpush3.bf16.msra.mxu0 %v1373_v59  ;;  %2348 = vmatprep.mubr.msk.bf16.mxu0 %vm2627_vm0, %v2626_v0  ;;  %2517 = vrcp.f32 %v1600_v60  ;;  %v1610_v10 = vsel %vm197_vm4, %v1605_v30, 0 }
 0x419   :  { %2358 = vmatprep.subr.bf16.mxu0 %v2626_v0 }
 0x41a   :  { %v2514_v1 = vpop.eup %2513 }
 0x41b   :  { %v1365_v26 = vmul.f32 %v2514_v1, %v2995_v40  ;;  %v1719_v2 = vpop.xlane.xlu1 %1718  ;;  %v1842_v45 = vpop.permute.xlu0 %1841 }
 0x41c   :  { %2519 = vrcp.f32 %v1719_v2  ;;  %v1847_v20 = vsel %vm197_vm4, %v1842_v45, 0 }
 0x41d   :  { %v1366_v3 = vpack.c.bf16 %v1365_v26, %v1365_v26 }
 0x41e   :  { %v2516_v11 = vpop.eup %2515 }
 0x41f   :  { %2349 = vmatmul.mubr.msk.bf16.vlgmr.msra.gmra.mrb[44].mxu0 %vm179_vm5, %v1366_v3  ;;  %v1837_v35 = vpop.xlane.xlu1 %1836  ;;  %v1484_v13 = vmul.f32 %v2516_v11, %v3000_v44  ;;  %v1961_v24 = vpop.permute.xlu0 %1960 }
 0x420   :  { %2359 = vmatpush3.bf16.msra.mxu0 %v1492_v7  ;;  %2360 = vmatprep.mubr.msk.bf16.mxu0 %vm2627_vm0, %v2626_v0  ;;  %2521 = vrcp.f32 %v1837_v35  ;;  %v1966_v22 = vsel %vm197_vm4, %v1961_v24, 0 }
 0x421   :  { %2370 = vmatprep.subr.bf16.mxu0 %v2626_v0  ;;  %v1485_v40 = vpack.c.bf16 %v1484_v13, %v1484_v13 }
 0x422   :  { %v2518_v8 = vpop.eup %2517 }
 0x423   :  { %v1956_v36 = vpop.xlane.xlu1 %1955  ;;  %v1602_v62 = vmul.f32 %v2518_v8, %v3006_v48 }
 0x424   :  { %2523 = vrcp.f32 %v1956_v36 }
 0x425   :  { %v1603_v12 = vpack.c.bf16 %v1602_v62, %v1602_v62 }
 0x426   :  { %v2520_v25 = vpop.eup %2519 }
 0x427   :  { %2361 = vmatmul.mubr.msk.bf16.vlgmr.msra.gmra.mrb[48].mxu0 %vm179_vm5, %v1485_v40  ;;  %v1724_v44 = vpop.permute.xlu1 %1723  ;;  %v1721_v19 = vmul.f32 %v2520_v25, %v3011_v52 }
 0x428   :  { %2371 = vmatpush3.bf16.msra.mxu0 %v1610_v10  ;;  %2372 = vmatprep.mubr.msk.bf16.mxu0 %vm2627_vm0, %v2626_v0  ;;  %v1729_v17 = vsel %vm197_vm4, %v1724_v44, 0 }
 0x429   :  { %2382 = vmatprep.subr.bf16.mxu0 %v2626_v0  ;;  %v1722_v48 = vpack.c.bf16 %v1721_v19, %v1721_v19 }
 0x42a   :  { %v2522_v15 = vpop.eup %2521 }
 0x42b   :  { %v1839_v23 = vmul.f32 %v2522_v15, %v3016_v14 }
 0x42d   :  { %v1840_v52 = vpack.c.bf16 %v1839_v23, %v1839_v23 }
 0x42e   :  { %v2524_v51 = vpop.eup %2523 }
 0x42f   :  { %2373 = vmatmul.mubr.msk.bf16.vlgmr.msra.gmra.mrb[52].mxu0 %vm179_vm5, %v1603_v12  ;;  %v1958_v41 = vmul.f32 %v2524_v51, %v3021_v55 }
 0x430   :  { %2383 = vmatpush3.bf16.msra.mxu0 %v1729_v17  ;;  %2384 = vmatprep.mubr.msk.bf16.mxu0 %vm2627_vm0, %v2626_v0 }
 0x431   :  { %2394 = vmatprep.subr.bf16.mxu0 %v2626_v0  ;;  %v1959_v27 = vpack.c.bf16 %v1958_v41, %v1958_v41 }
 0x437   :  { %2385 = vmatmul.mubr.msk.bf16.vlgmr.msra.gmra.mrb[56].mxu0 %vm179_vm5, %v1722_v48 }
 0x438   :  { %2395 = vmatpush3.bf16.msra.mxu0 %v1847_v20  ;;  %2396 = vmatprep.mubr.msk.bf16.mxu0 %vm2627_vm0, %v2626_v0 }
 0x439   :  { %2406 = vmatprep.subr.bf16.mxu0 %v2626_v0 }
 0x43f   :  { %2397 = vmatmul.mubr.msk.bf16.vlgmr.msra.gmra.mrb[60].mxu0 %vm179_vm5, %v1840_v52  ;;  %v2459_v52 = vld [vmem:[#allocation9] sm:$0xff]  }
 0x440   :  { %2407 = vmatpush3.bf16.msra.mxu0 %v1966_v22  ;;  %2408 = vmatprep.mubr.msk.bf16.mxu0 %vm2627_vm0, %v2626_v0  ;;  %v2460_v22 = vld [vmem:[#allocation9 + $0x8] sm:$0xff]  }
 0x441   :  { %2413 = vmatpush3.bf16.msra.mxu1 %v2459_v52 }
 0x442   :  { %2414 = vmatprep.subr.bf16.mxu1 %v2626_v0 }
 0x445   :  { %2415 = vmatpush3.bf16.msra.mxu1 %v2460_v22 }
 0x447   :  { %2409 = vmatmul.mubr.msk.bf16.vlgmr.msra.gmra.mrb[64].mxu0 %vm179_vm5, %v1959_v27 }
 0x47d   :  { %v235_v28 = vpop.f32.mrb[4].mxu0 }
 0x47e   :  { %241 = vst.msk [vmem:[#allocation3] sm:$0xff] %vm132_vm3, %v235_v28  ;;  %v2230_v14 = vpop.f32.mrb[5].mxu0 }
 0x47f   :  { %v238_v29 = vpop.f32.mrb[6].mxu0 }
 0x480   :  { %v2231_v33 = vpop.f32.mrb[7].mxu0 }
 0x485   :  { %v347_v56 = vpop.f32.mrb[8].mxu0 }
 0x486   :  { %353 = vst.msk [vmem:[#allocation3 + $0x8] sm:$0xff] %vm132_vm3, %v347_v56  ;;  %v2242_v46 = vpop.f32.mrb[9].mxu0 }
 0x487   :  { %v350_v34 = vpop.f32.mrb[10].mxu0 }
 0x488   :  { %v2243_v61 = vpop.f32.mrb[11].mxu0 }
 0x48d   :  { %v461_v37 = vpop.f32.mrb[12].mxu0 }
 0x48e   :  { %468 = vrot.lane.b32.xlu0 %v461_v37, %s2621_s26  ;;  %v2254_v38 = vpop.f32.mrb[13].mxu0 }
 0x48f   :  { %v464_v55 = vpop.f32.mrb[14].mxu0 }
 0x490   :  { %v2255_v39 = vpop.f32.mrb[15].mxu0 }
 0x495   :  { %v580_v50 = vpop.f32.mrb[16].mxu0 }
 0x496   :  { %587 = vrot.lane.b32.xlu0 %v580_v50, %s2621_s26  ;;  %v2266_v42 = vpop.f32.mrb[17].mxu0  ;;  %s2651_s26 = smov 16  }
 0x497   :  { %v583_v54 = vpop.f32.mrb[18].mxu0 }
 0x498   :  { %v2267_v5 = vpop.f32.mrb[19].mxu0 }
 0x49d   :  { %v698_v43 = vpop.f32.mrb[20].mxu0 }
 0x49e   :  { %705 = vrot.lane.b32.xlu0 %v698_v43, %s2624_s13  ;;  %v2278_v4 = vpop.f32.mrb[21].mxu0 }
 0x49f   :  { %v701_v58 = vpop.f32.mrb[22].mxu0 }
 0x4a0   :  { %v2279_v47 = vpop.f32.mrb[23].mxu0 }
 0x4a1   :  { %v2138_v47 = vld [vmem:[%s3157_s3] ss:$0 sm:$0xff] }
 0x4ae   :  { %v817_v31 = vpop.f32.mrb[24].mxu0 }
 0x4af   :  { %824 = vrot.lane.b32.xlu1 %v817_v31, %s2624_s13  ;;  %v2290_v63 = vpop.f32.mrb[25].mxu0 }
 0x4b0   :  { %v820_v9 = vpop.f32.mrb[26].mxu0 }
 0x4b1   :  { %v2291_v49 = vpop.f32.mrb[27].mxu0 }
 0x4b6   :  { %v935_v6 = vpop.f32.mrb[28].mxu0 }
 0x4b7   :  { %942 = vrot.lane.b32.xlu0 %v935_v6, %s2650_s24  ;;  %v2302_v16 = vpop.f32.mrb[29].mxu0 }
 0x4b8   :  { %v938_v53 = vpop.f32.mrb[30].mxu0 }
 0x4b9   :  { %v2303_v18 = vpop.f32.mrb[31].mxu0 }
 0x4be   :  { %v1054_v57 = vpop.f32.mrb[32].mxu0 }
 0x4bf   :  { %1061 = vrot.lane.b32.xlu1 %v1054_v57, %s2650_s24  ;;  %v2314_v21 = vpop.f32.mrb[33].mxu0 }
 0x4c0   :  { %v1057_v59 = vpop.f32.mrb[34].mxu0 }
 0x4c1   :  { %v2315_v60 = vpop.f32.mrb[35].mxu0 }
 0x4de   :  { %v1172_v1 = vpop.f32.mrb[36].mxu0 }
 0x4df   :  { %1179 = vrot.lane.b32.xlu0 %v1172_v1, %s2651_s26  ;;  %v2326_v26 = vpop.f32.mrb[37].mxu0 }
 0x4e0   :  { %v1175_v2 = vpop.f32.mrb[38].mxu0 }
 0x4e1   :  { %v2327_v32 = vpop.f32.mrb[39].mxu0 }
 0x4ea   :  { %v1291_v3 = vpop.f32.mrb[40].mxu0 }
 0x4eb   :  { %1298 = vrot.lane.b32.xlu1 %v1291_v3, %s2651_s26  ;;  %v2338_v11 = vpop.f32.mrb[41].mxu0 }
 0x4ec   :  { %v1294_v7 = vpop.f32.mrb[42].mxu0 }
 0x4ed   :  { %v2339_v35 = vpop.f32.mrb[43].mxu0 }
 0x4f2   :  { %v1409_v13 = vpop.f32.mrb[44].mxu0 }
 0x4f3   :  { %1416 = vrot.lane.b32.xlu0 %v1409_v13, %s2652_s27  ;;  %v2350_v30 = vpop.f32.mrb[45].mxu0 }
 0x4f4   :  { %v1412_v40 = vpop.f32.mrb[46].mxu0 }
 0x4f5   :  { %v2351_v8 = vpop.f32.mrb[47].mxu0 }
 0x4fa   :  { %v1528_v36 = vpop.f32.mrb[48].mxu0 }
 0x4fb   :  { %1535 = vrot.lane.b32.xlu1 %v1528_v36, %s2652_s27  ;;  %v2362_v10 = vpop.f32.mrb[49].mxu0 }
 0x4fc   :  { %v1531_v62 = vpop.f32.mrb[50].mxu0 }
 0x4fd   :  { %v2363_v44 = vpop.f32.mrb[51].mxu0 }
 0x500   :  { %v469_v12 = vpop.permute.xlu0 %468 }
 0x501   :  { %472 = vst.msk [vmem:[#allocation3] sm:$0xff] %vm471_vm6, %v469_v12 }
 0x502   :  { %v1646_v25 = vpop.f32.mrb[52].mxu0 }
 0x503   :  { %1653 = vrot.lane.b32.xlu0 %v1646_v25, %s2653_s0  ;;  %v2374_v17 = vpop.f32.mrb[53].mxu0 }
 0x504   :  { %v1649_v19 = vpop.f32.mrb[54].mxu0 }
 0x505   :  { %v2375_v45 = vpop.f32.mrb[55].mxu0 }
 0x508   :  { %v588_v48 = vpop.permute.xlu0 %587 }
 0x509   :  { %590 = vst.msk [vmem:[#allocation3 + $0x8] sm:$0xff] %vm471_vm6, %v588_v48 }
 0x50a   :  { %v1765_v15 = vpop.f32.mrb[56].mxu0 }
 0x50b   :  { %1772 = vrot.lane.b32.xlu1 %v1765_v15, %s2653_s0  ;;  %v2386_v20 = vpop.f32.mrb[57].mxu0 }
 0x50c   :  { %v1768_v23 = vpop.f32.mrb[58].mxu0 }
 0x50d   :  { %v2387_v24 = vpop.f32.mrb[59].mxu0 }
 0x510   :  { %v706_v51 = vpop.permute.xlu0 %705 }
 0x511   :  { %709 = vst.msk [vmem:[#allocation3] sm:$0xff] %vm708_vm7, %v706_v51 }
 0x512   :  { %v1883_v41 = vpop.f32.mrb[60].mxu0 }
 0x513   :  { %1890 = vrot.lane.b32.xlu0 %v1883_v41, %s2654_s28  ;;  %v2398_v27 = vpop.f32.mrb[61].mxu0 }
 0x514   :  { %v1886_v28 = vpop.f32.mrb[62].mxu0 }
 0x515   :  { %v2399_v14 = vpop.f32.mrb[63].mxu0 }
 0x51a   :  { %v2002_v29 = vpop.f32.mrb[64].mxu0 }
 0x51b   :  { %2009 = vrot.lane.b32.xlu1 %v2002_v29, %s2654_s28  ;;  %v2410_v33 = vpop.f32.mrb[65].mxu0 }
 0x51c   :  { %v2005_v56 = vpop.f32.mrb[66].mxu0 }
 0x51d   :  { %v2411_v46 = vpop.f32.mrb[67].mxu0 }
 0x521   :  { %v825_v34 = vpop.permute.xlu1 %824 }
 0x522   :  { %827 = vst.msk [vmem:[#allocation3 + $0x8] sm:$0xff] %vm708_vm7, %v825_v34 }
 0x529   :  { %v943_v61 = vpop.permute.xlu0 %942 }
 0x52a   :  { %946 = vst.msk [vmem:[#allocation3] sm:$0xff] %vm945_vm8, %v943_v61 }
 0x531   :  { %v1062_v37 = vpop.permute.xlu1 %1061 }
 0x532   :  { %1064 = vst.msk [vmem:[#allocation3 + $0x8] sm:$0xff] %vm945_vm8, %v1062_v37 }
 0x551   :  { %v1180_v0 = vpop.permute.xlu0 %1179 }
 0x552   :  { %1183 = vst.msk [vmem:[#allocation3] sm:$0xff] %vm1182_vm9, %v1180_v0 }
 0x55d   :  { %v1299_v38 = vpop.permute.xlu1 %1298 }
 0x55e   :  { %1301 = vst.msk [vmem:[#allocation3 + $0x8] sm:$0xff] %vm1182_vm9, %v1299_v38 }
 0x565   :  { %v1417_v55 = vpop.permute.xlu0 %1416 }
 0x566   :  { %1420 = vst.msk [vmem:[#allocation3] sm:$0xff] %vm1419_vm10, %v1417_v55 }
 0x56d   :  { %v1536_v39 = vpop.permute.xlu1 %1535 }
 0x56e   :  { %1538 = vst.msk [vmem:[#allocation3 + $0x8] sm:$0xff] %vm1419_vm10, %v1536_v39 }
 0x575   :  { %v1654_v50 = vpop.permute.xlu0 %1653 }
 0x576   :  { %1657 = vst.msk [vmem:[#allocation3] sm:$0xff] %vm1656_vm11, %v1654_v50 }
 0x57d   :  { %v1773_v42 = vpop.permute.xlu1 %1772 }
 0x57e   :  { %1775 = vst.msk [vmem:[#allocation3 + $0x8] sm:$0xff] %vm1656_vm11, %v1773_v42 }
 0x585   :  { %v1891_v54 = vpop.permute.xlu0 %1890 }
 0x586   :  { %1894 = vst.msk [vmem:[#allocation3] sm:$0xff] %vm1893_vm12, %v1891_v54 }
 0x58d   :  { %v2010_v5 = vpop.permute.xlu1 %2009  ;;  %v2013_v43 = vld [vmem:[#allocation3] sm:$0xff] }
 0x58e   :  { %2012 = vst.msk [vmem:[#allocation3 + $0x8] sm:$0xff] %vm1893_vm12, %v2010_v5 }
 0x595   :  { %v2014_v4 = vld [vmem:[#allocation3 + $0x8] sm:$0xff] }
 0x596   :  { %v2015_v58 = vpack.c.bf16 %v2014_v4, %v2013_v43 }
 0x598   :  { %2417 = vmatmul.mubr.msk.bf16.vlgmr.msra.gmra.mrb[64].mxu1 %vm79_vm1, %v2015_v58 }
 0x66b   :  { %v2076_v31 = vpop.f32.mrb[64].mxu1 }
 0x66c   :  { %v2077_v63 = vadd.f32 %v2138_v47, %v2076_v31  ;;  %v2418_v9 = vpop.f32.mrb[65].mxu1 }
 0x66d   :  { %v2079_v49 = vpop.f32.mrb[66].mxu1 }
 0x66e   :  { %2083 = vst.msk [vmem:[#allocation10] sm:$0xff] %vm79_vm1, %v2077_v63  ;;  %v2080_v6 = vadd.f32 %v2138_v47, %v2079_v49  ;;  %v2419_v16 = vpop.f32.mrb[67].mxu1 }
 0x670   :  { %2084 = vst.msk [vmem:[#allocation10 + $0x8] sm:$0xff] %vm79_vm1, %v2080_v6 }
 0x671   :  { %2602 = shalt.err (!%p2599_p0)
}
 0x672   :  { %s2603_s8 = scalar_lea.hbm %s3158_s4, 256 }
 0x673   :  { %p2604_p1 = scmp.ne.s32.totalorder %s3158_s4, %s2603_s8  ;;  %p2607_p2 = scmp.lt.u32.totalorder %s2603_s8, %s3158_s4 }
 0x675   :  { %p2609_p3 = pnand %p2607_p2, %p2604_p1 }
 0x677   :  { %2612 = shalt.err (!%p2609_p3)
}
 0x678   :  { %2096 = dma.vmem_to_hbm [thread:$0]  %s2091_s5, 256, %s3158_s4, [#allocation6], %s2623_s1, %s2623_s1, %s2624_s13  }
 0x679   :  { %2617 = dma.done.wait [#allocation6], 256  }
 0x67a   :  { %2618 = vsyncadd [#allocation6], 4294967040 }
 0x67b   :  { %2100 = vsyncpa [#allocation5], 1 }
 0x67c   :  { %2101 = vsyncpa [#allocation8], 1 }
 0x67d   :  { %2102 = vsyncpa [#allocation6], 1 }

</bundles_post_ra>
